<compile_context>
chip_gen: v6e
topology: v6e:2x2x1
jax: 0.10.0
libtpu: 0.0.40
codegen_flags: <defaults>
</compile_context>

<pallas_src>
import jax
import jax.numpy as jnp
from jax.experimental import pallas as pl
from jax.experimental.pallas import tpu as pltpu

MAX_TILE = 16384          # upper bound on batch rows (lanes) per grid step
MIN_TILE = 1024           # lower bound (keeps per-step overhead amortized)
TARGET_GRID_STEPS = 8     # keep several steps so v7x megacore has work to split
MIN_PALLAS_ROWS = 1024    # below this, XLA fusion beats kernel launch overhead


def _pick_tile(n):
    """Lane tile: aim for ~TARGET_GRID_STEPS steps, clamp, multiple of 128."""
    t = pl.cdiv(n, TARGET_GRID_STEPS)
    t = pl.cdiv(t, 128) * 128
    return max(MIN_TILE, min(MAX_TILE, t))


def _net_kernel(xt_ref, w1t_ref, b1_ref, w2t_ref, b2_ref, w3_ref, b3_ref, o_ref):
    # Transposed layout: features on sublanes, batch on lanes.
    xt = xt_ref[...]            # (2, T)
    w1t = w1t_ref[...]          # (12, 2)   == w1.T
    w2t = w2t_ref[...]          # (24, 12)  == w2.T
    w3c = w3_ref[...]           # (24, 1)
    b1c = b1_ref[...]           # (12, 1)
    b2c = b2_ref[...]           # (24, 1)
    b3c = b3_ref[...]           # (1, 1)

    # Layer 1 (K=2): two VPU broadcast-MACs (cheaper than an MXU K=2 matmul).
    h1 = jnp.tanh(w1t[:, 0:1] * xt[0:1, :] + w1t[:, 1:2] * xt[1:2, :] + b1c)  # (12, T)

    # Layer 2 (12 -> 24): MXU matmul on lane-dense activations.
    z2 = jnp.dot(w2t, h1, preferred_element_type=jnp.float32,
                 precision=jax.lax.Precision.HIGHEST)
    h2 = jnp.tanh(z2 + b2c)                                                    # (24, T)

    # Layer 3 (24 -> 1): elementwise product + sublane (XLU) reduce.
    z3 = jnp.sum(w3c * h2, axis=0, keepdims=True) + b3c                        # (1, T)
    o_ref[...] = jax.nn.sigmoid(z3).astype(o_ref.dtype)


def _reference(x, w1, b1, w2, b2, w3, b3):
    p = jax.lax.Precision.HIGHEST
    h1 = jnp.tanh(jnp.dot(x, w1, precision=p) + b1)
    h2 = jnp.tanh(jnp.dot(h1, w2, precision=p) + b2)
    return jax.nn.sigmoid(jnp.dot(h2, w3, precision=p) + b3)


def net_forward(x, w1, b1, w2, b2, w3, b3, *, tile=None):
    """MLP forward. x: (N, 2) float32 -> (N, 1) float32."""
    n = x.shape[0]
    if n < MIN_PALLAS_ROWS:
        # Small-batch fast path: kernel launch overhead dominates here.
        return _reference(x, w1, b1, w2, b2, w3, b3)
    if tile is None:
        tile = _pick_tile(n)

    # Feature-major (2, N) layout for lane-dense kernel access.
    # TODO(synk): have the producer emit x feature-major to avoid this transpose copy.
    xt = x.astype(jnp.float32).T                          # (2, N)
    w1t = w1.T.astype(jnp.float32)                        # (12, 2)
    w2t = w2.T.astype(jnp.float32)                        # (24, 12)
    w3c = w3.reshape(-1, 1).astype(jnp.float32)           # (24, 1)
    b1c = b1.reshape(-1, 1).astype(jnp.float32)           # (12, 1)
    b2c = b2.reshape(-1, 1).astype(jnp.float32)           # (24, 1)
    b3c = b3.reshape(1, 1).astype(jnp.float32)            # (1, 1)

    const = lambda shape: pl.BlockSpec(shape, lambda i: (0, 0))
    grid = (pl.cdiv(n, tile),)                            # ragged last block is masked

    out = pl.pallas_call(
        _net_kernel,
        out_shape=jax.ShapeDtypeStruct((1, n), jnp.float32),
        grid=grid,
        in_specs=[
            pl.BlockSpec((2, tile), lambda i: (0, i)),    # streamed input tile
            const(w1t.shape), const(b1c.shape),           # resident params
            const(w2t.shape), const(b2c.shape),
            const(w3c.shape), const(b3c.shape),
        ],
        out_specs=pl.BlockSpec((1, tile), lambda i: (0, i)),  # lane-dense store
        compiler_params=pltpu.CompilerParams(
            dimension_semantics=("parallel",),
            vmem_limit_bytes=32 * 1024 * 1024),
        cost_estimate=pl.CostEstimate(
            flops=2 * n * (2 * 12 + 12 * 24 + 24),
            transcendentals=37 * n,
            bytes_accessed=12 * n),
    )(xt, w1t, b1c, w2t, b2c, w3c, b3c)

    return out.reshape(n, 1)


if __name__ == "__main__":
    key = jax.random.PRNGKey(0)
    kx, kr, ks, k1, k2, k3 = jax.random.split(key, 6)

    # Deterministic parameter init matching torch.randn / torch.zeros shapes.
    w1 = jax.random.normal(k1, (2, 12), dtype=jnp.float32)
    b1 = jnp.zeros((12,), dtype=jnp.float32)
    w2 = jax.random.normal(k2, (12, 24), dtype=jnp.float32)
    b2 = jnp.zeros((24,), dtype=jnp.float32)
    w3 = jax.random.normal(k3, (24, 1), dtype=jnp.float32)
    b3 = jnp.zeros((1,), dtype=jnp.float32)

    fwd = jax.jit(net_forward)

    # Tiled Pallas path (grid of 4 lane tiles at the adaptive minimum tile).
    n = 4096
    x = jax.random.normal(kx, (n, 2), dtype=jnp.float32)
    out = jax.block_until_ready(fwd(x, w1, b1, w2, b2, w3, b3))
    ref = _reference(x, w1, b1, w2, b2, w3, b3)
    assert out.shape == (n, 1), out.shape
    assert jnp.allclose(out, ref, atol=1e-4, rtol=1e-4)

    # Ragged batch: last grid block is partially out-of-bounds (masked by Pallas).
    nr = 3000
    xr = jax.random.normal(kr, (nr, 2), dtype=jnp.float32)
    outr = jax.block_until_ready(fwd(xr, w1, b1, w2, b2, w3, b3))
    refr = _reference(xr, w1, b1, w2, b2, w3, b3)
    assert outr.shape == (nr, 1), outr.shape
    assert jnp.allclose(outr, refr, atol=1e-4, rtol=1e-4)

    # Small-batch path (XLA fallback) stays numerically identical.
    xs = jax.random.normal(ks, (8, 2), dtype=jnp.float32)
    outs = jax.block_until_ready(fwd(xs, w1, b1, w2, b2, w3, b3))
    refs = _reference(xs, w1, b1, w2, b2, w3, b3)
    assert outs.shape == (8, 1), outs.shape
    assert jnp.allclose(outs, refs, atol=1e-4, rtol=1e-4)

    print("KERNEL_OK")
</pallas_src>

<mosaic_0001>
module attributes {stable_mosaic.version = 11 : i64} {
  func.func @_net_kernel(%arg0: i32, %arg1: memref<2x1024xf32, #tpu.memory_space<vmem>>, %arg2: memref<12x2xf32, #tpu.memory_space<vmem>>, %arg3: memref<12x1xf32, #tpu.memory_space<vmem>>, %arg4: memref<24x12xf32, #tpu.memory_space<vmem>>, %arg5: memref<24x1xf32, #tpu.memory_space<vmem>>, %arg6: memref<24x1xf32, #tpu.memory_space<vmem>>, %arg7: memref<1x1xf32, #tpu.memory_space<vmem>>, %arg8: memref<1x1024xf32, #tpu.memory_space<vmem>>) attributes {dimension_semantics = [#tpu.dimension_semantics<parallel>], iteration_bounds = array<i64: 4>, scalar_prefetch = 0 : i64, scratch_operands = 0 : i64, tpu.core_type = #tpu.core_type<tc>, window_params = [{transform_indices = @transform_0, window_bounds = array<i64: 2, 1024>}, {pipeline_mode = #tpu.pipeline_mode<synchronous>, transform_indices = @transform_1, window_bounds = array<i64: 12, 2>}, {pipeline_mode = #tpu.pipeline_mode<synchronous>, transform_indices = @transform_2, window_bounds = array<i64: 12, 1>}, {pipeline_mode = #tpu.pipeline_mode<synchronous>, transform_indices = @transform_3, window_bounds = array<i64: 24, 12>}, {pipeline_mode = #tpu.pipeline_mode<synchronous>, transform_indices = @transform_4, window_bounds = array<i64: 24, 1>}, {pipeline_mode = #tpu.pipeline_mode<synchronous>, transform_indices = @transform_5, window_bounds = array<i64: 24, 1>}, {pipeline_mode = #tpu.pipeline_mode<synchronous>, transform_indices = @transform_6, window_bounds = array<i64: 1, 1>}, {transform_indices = @transform_7, window_bounds = array<i64: 1, 1024>}]} {
    %c0 = arith.constant 0 : index
    %c0_0 = arith.constant 0 : index
    %0 = vector.load %arg1[%c0, %c0_0] : memref<2x1024xf32, #tpu.memory_space<vmem>>, vector<2x1024xf32>
    %c0_1 = arith.constant 0 : index
    %c0_2 = arith.constant 0 : index
    %1 = vector.load %arg2[%c0_1, %c0_2] : memref<12x2xf32, #tpu.memory_space<vmem>>, vector<12x2xf32>
    %c0_3 = arith.constant 0 : index
    %c0_4 = arith.constant 0 : index
    %2 = vector.load %arg4[%c0_3, %c0_4] : memref<24x12xf32, #tpu.memory_space<vmem>>, vector<24x12xf32>
    %c0_5 = arith.constant 0 : index
    %c0_6 = arith.constant 0 : index
    %3 = vector.load %arg6[%c0_5, %c0_6] : memref<24x1xf32, #tpu.memory_space<vmem>>, vector<24x1xf32>
    %c0_7 = arith.constant 0 : index
    %c0_8 = arith.constant 0 : index
    %4 = vector.load %arg3[%c0_7, %c0_8] : memref<12x1xf32, #tpu.memory_space<vmem>>, vector<12x1xf32>
    %c0_9 = arith.constant 0 : index
    %c0_10 = arith.constant 0 : index
    %5 = vector.load %arg5[%c0_9, %c0_10] : memref<24x1xf32, #tpu.memory_space<vmem>>, vector<24x1xf32>
    %c0_11 = arith.constant 0 : index
    %c0_12 = arith.constant 0 : index
    %6 = vector.load %arg7[%c0_11, %c0_12] : memref<1x1xf32, #tpu.memory_space<vmem>>, vector<1x1xf32>
    %7 = vector.extract_strided_slice %1 {offsets = [0, 0], sizes = [12, 1], strides = [1, 1]} : vector<12x2xf32> to vector<12x1xf32>
    %8 = vector.extract_strided_slice %0 {offsets = [0, 0], sizes = [1, 1024], strides = [1, 1]} : vector<2x1024xf32> to vector<1x1024xf32>
    %9 = vector.broadcast %7 : vector<12x1xf32> to vector<12x1024xf32>
    %10 = vector.broadcast %8 : vector<1x1024xf32> to vector<12x1024xf32>
    %11 = arith.mulf %9, %10 : vector<12x1024xf32>
    %12 = vector.extract_strided_slice %1 {offsets = [0, 1], sizes = [12, 1], strides = [1, 1]} : vector<12x2xf32> to vector<12x1xf32>
    %13 = vector.extract_strided_slice %0 {offsets = [1, 0], sizes = [1, 1024], strides = [1, 1]} : vector<2x1024xf32> to vector<1x1024xf32>
    %14 = vector.broadcast %12 : vector<12x1xf32> to vector<12x1024xf32>
    %15 = vector.broadcast %13 : vector<1x1024xf32> to vector<12x1024xf32>
    %16 = arith.mulf %14, %15 : vector<12x1024xf32>
    %17 = arith.addf %11, %16 : vector<12x1024xf32>
    %18 = vector.broadcast %4 : vector<12x1xf32> to vector<12x1024xf32>
    %19 = arith.addf %17, %18 : vector<12x1024xf32>
    %20 = math.tanh %19 : vector<12x1024xf32>
    %cst = arith.constant dense<0.000000e+00> : vector<24x1024xf32>
    %21 = tpu.matmul %2, %20, %cst {dimension_numbers = #tpu.dot_dimension_numbers<[1], [0], [0], [1], [0, 0, 1, 1], [], []>, precision = #tpu.contract_precision<fp32>} : vector<24x12xf32>, vector<12x1024xf32>, vector<24x1024xf32> -> vector<24x1024xf32>
    %22 = vector.broadcast %5 : vector<24x1xf32> to vector<24x1024xf32>
    %23 = arith.addf %21, %22 : vector<24x1024xf32>
    %24 = math.tanh %23 : vector<24x1024xf32>
    %25 = vector.broadcast %3 : vector<24x1xf32> to vector<24x1024xf32>
    %26 = arith.mulf %25, %24 : vector<24x1024xf32>
    %cst_13 = arith.constant dense<0.000000e+00> : vector<1024xf32>
    %27 = vector.multi_reduction <add>, %26, %cst_13 [0] : vector<24x1024xf32> to vector<1024xf32>
    %28 = vector.shape_cast %27 : vector<1024xf32> to vector<1x1024xf32>
    %29 = vector.broadcast %6 : vector<1x1xf32> to vector<1x1024xf32>
    %30 = arith.addf %28, %29 : vector<1x1024xf32>
    %31 = arith.negf %30 : vector<1x1024xf32>
    %32 = math.exp %31 : vector<1x1024xf32>
    %cst_14 = arith.constant 1.000000e+00 : f32
    %33 = vector.broadcast %cst_14 : f32 to vector<1x1024xf32>
    %34 = arith.addf %33, %32 : vector<1x1024xf32>
    %35 = arith.divf %33, %34 : vector<1x1024xf32>
    %c0_15 = arith.constant 0 : index
    %c0_16 = arith.constant 0 : index
    %36 = vector.load %arg8[%c0_15, %c0_16] : memref<1x1024xf32, #tpu.memory_space<vmem>>, vector<1x1024xf32>
    tpu.vector_store %arg8[%c0_15, %c0_16], %35 {strides = array<i32>} : memref<1x1024xf32, #tpu.memory_space<vmem>>, vector<1x1024xf32>,
    return
  }
  func.func @transform_0(%arg0: i32) -> (i32, i32) {
    %c0_i32 = arith.constant 0 : i32
    %c0_i32_0 = arith.constant 0 : i32
    return %c0_i32, %arg0 : i32, i32
  }
  func.func @transform_1(%arg0: i32) -> (i32, i32) {
    %c0_i32 = arith.constant 0 : i32
    %c0_i32_0 = arith.constant 0 : i32
    %c0_i32_1 = arith.constant 0 : i32
    return %c0_i32, %c0_i32_0 : i32, i32
  }
  func.func @transform_2(%arg0: i32) -> (i32, i32) {
    %c0_i32 = arith.constant 0 : i32
    %c0_i32_0 = arith.constant 0 : i32
    %c0_i32_1 = arith.constant 0 : i32
    return %c0_i32, %c0_i32_0 : i32, i32
  }
  func.func @transform_3(%arg0: i32) -> (i32, i32) {
    %c0_i32 = arith.constant 0 : i32
    %c0_i32_0 = arith.constant 0 : i32
    %c0_i32_1 = arith.constant 0 : i32
    return %c0_i32, %c0_i32_0 : i32, i32
  }
  func.func @transform_4(%arg0: i32) -> (i32, i32) {
    %c0_i32 = arith.constant 0 : i32
    %c0_i32_0 = arith.constant 0 : i32
    %c0_i32_1 = arith.constant 0 : i32
    return %c0_i32, %c0_i32_0 : i32, i32
  }
  func.func @transform_5(%arg0: i32) -> (i32, i32) {
    %c0_i32 = arith.constant 0 : i32
    %c0_i32_0 = arith.constant 0 : i32
    %c0_i32_1 = arith.constant 0 : i32
    return %c0_i32, %c0_i32_0 : i32, i32
  }
  func.func @transform_6(%arg0: i32) -> (i32, i32) {
    %c0_i32 = arith.constant 0 : i32
    %c0_i32_0 = arith.constant 0 : i32
    %c0_i32_1 = arith.constant 0 : i32
    return %c0_i32, %c0_i32_0 : i32, i32
  }
  func.func @transform_7(%arg0: i32) -> (i32, i32) {
    %c0_i32 = arith.constant 0 : i32
    %c0_i32_0 = arith.constant 0 : i32
    return %c0_i32, %arg0 : i32, i32
  }
}

</mosaic_0001>

<bundles_post_ra>
// kernel: net_forward.1
= control target key start
LH: loop header
LB: loop body
LE: loop exit
PB: predicated region body
PF: predicated region fallthrough
CT: control target
= control target key end

     0   :  { %s4494_s0 = inlined_call_operand.hbm [shape: f32[2,4096], index: 0, kind: input, shape index: {}]   ;;  %s4495_s1 = inlined_call_operand.vmem [shape: f32[12,2], index: 1, kind: input, shape index: {}]   ;;  %s4496_s2 = inlined_call_operand.vmem [shape: f32[12,1], index: 2, kind: input, shape index: {}]   ;;  %s4497_s3 = inlined_call_operand.vmem [shape: f32[24,12], index: 3, kind: input, shape index: {}]   ;;  %s4498_s4 = inlined_call_operand.vmem [shape: f32[24,1], index: 4, kind: input, shape index: {}]   ;;  %s4499_s5 = inlined_call_operand.vmem [shape: f32[24,1], index: 5, kind: input, shape index: {}]   ;;  %s4500_s6 = inlined_call_operand.<no memory space> [shape: f32[1,1], index: 6, kind: input, shape index: {}]   ;;  %s4501_s7 = inlined_call_operand.hbm [shape: f32[1,4096], index: 7, kind: output, shape index: {}]  }
   0x1   :  { %v12_v0 = vstv %s4500_s6 }
   0x2   :  { %13 = vst [vmem:[#allocation2] sm:$0x1] %v12_v0 }
   0x3   :  { %14 = vsyncpa [#allocation4], 0 }
   0x4   :  { %16 = vsyncpa [#allocation4 + $0x1], 0 }
   0x5   :  { %17 = vsyncpa [#allocation5], 0 }
   0x6   :  { %19 = vsyncpa [#allocation5 + $0x1], 0  ;;  %s3646_s26 = smov 0   ;;  %s3648_s27 = smov 0  }
   0x7   :  { %s3650_s28 = smov 0   ;;  %s3652_s29 = smov 0  }
   0x8 LB: > { %s3667_s6 = sadd.s32 4294967295, %s3595_s29   ;;  %s3311_s30 = sadd.s32 4294967294, %s3595_s29   ;;  %s3595_s29 = sphi %s3652_s29, %s4517_s29   ;;  %s3591_s28 = sphi %s3650_s28, %s4516_s28   ;;  %s3587_s27 = sphi %s3648_s27, %s4515_s27   ;;  %s3583_s26 = sphi %s3646_s26, %s4514_s26  }
   0x9   : > { %s3671_s8 = sadd.s32 1, %s3595_s29   ;;  %s32_s9 = sadd.s32 1, %s3591_s28 }
   0xa   : > { %s29_s10 = ssub.s32 %s3595_s29, %s3671_s8  ;;  %p39_p0 = scmp.ne.s32.totalorder %s3591_s28, %s3587_s27 }
   0xb   : > { %p30_p1 = scmp.eq.s32.totalorder %s29_s10, 0  ;;  %p40_p2 = scmp.eq.s32.totalorder %s3595_s29, 0 }
   0xc   : > { %p45_p3 = scmp.ne.s32.totalorder %s3587_s27, %s3583_s26  ;;  %p46_p4 = scmp.eq.s32.totalorder %s3667_s6, 0 }
   0xd   : > { %s3683_s11 = scalar_select %p30_p1, %s3591_s28, %s32_s9  }
   0xe   : > { %p3685_p5 = por %p40_p2, %p39_p0  ;;  %p3689_p6 = por %p46_p4, %p45_p3 }
   0xf   : > { %p195_p7 = scmp.eq.s32.totalorder %s3667_s6, 3  ;;  %p201_p8 = scmp.eq.s32.totalorder %s3311_s30, 3 }
  0x10   : > { %s4505_s13 = scalar_select %p3689_p6, 1, 0 }
  0x11   : > { %p3347_p9 = scmp.lt.s32.totalorder %s3595_s29, 4  ;;  %p3695_p10 = por %p195_p7, %p39_p0 }
  0x12   : > { %p3699_p11 = por %p201_p8, %p45_p3  ;;  %s239_s16 = sand.u32 1, %s3591_s28  }
  0x13   : > { %s4506_s14 = scalar_select %p3695_p10, 1, 0 }
  0x14   : > { %s4507_s15 = scalar_select %p3699_p11, 1, 0 }
  0x15   : > { %s3333_s17 = sshll.u32 %s3595_s29, 8  ;;  %s3314_s18 = sshll.u32 %s239_s16, 4 }
  0x16   : > { %s3708_s21 = scalar_lea.hbm %s4494_s0, %s3333_s17  ;;  %s243_s22 = scalar_lea.vmem [#allocation3], %s3314_s18 }
  0x17   : > { %s251_s23 = sshll.u32 %s243_s22, 4  ;;  %p3712_p12 = pnand %p3347_p9, %p3685_p5  ;;  %s3716_s23 = int_to_ptr.vmem [resolvable:$true] %s251_s23 }
  0x18   : > { %s240_s25 = scalar_lea.sflag [#allocation4], %s239_s16  ;;  %s3503_s30 = scalar_lea.hbm %s3708_s21, 256 }
  0x19   : > { %p3504_p1 = scmp.ne.s32.totalorder %s3708_s21, %s3503_s30  ;;  %p3505_p2 = pneg %p3712_p12 }
  0x1a   : > { %s3508_s12 = scalar_lea.hbm %s4494_s0, 1024  ;;  %p3509_p5 = scmp.lt.s32.totalorder %s3708_s21, %s4494_s0 }
  0x1b   : > { %p3506_p3 = pnand %p3505_p2, %p3504_p1  ;;  %p3510_p7 = scmp.lt.s32.totalorder %s3508_s12, %s3503_s30 }
  0x1d   : > { %p3507_p4 = pneg %p3506_p3  ;;  %p3511_p8 = por %p3510_p7, %p3509_p5 }
  0x1f   : > { %p3512_p9 = pnand %p3511_p8, %p3507_p4 }
  0x21   : > { %3515 = shalt.err (!%p3512_p9)
}
  0x22   : > { %s3516_s16 = scalar_lea.vmem %s3716_s23, 256  ;;  %s3597_s19 = smov [#allocation3]  }
  0x23   : > { %p3517_p13 = scmp.ne.s32.totalorder %s3716_s23, %s3516_s16  ;;  %s3521_s20 = sshll.u32 %s3597_s19, 4  ;;  %s3522_s20 = int_to_ptr.vmem [resolvable:$false] %s3521_s20 }
  0x24   : > { %s3523_s22 = scalar_lea.vmem %s3522_s20, 512  ;;  %p3524_p3 = scmp.lt.s32.totalorder %s3716_s23, %s3522_s20 }
  0x25   : > { %p3519_p0 = pnand %p3517_p13, %p3505_p2  ;;  %p3525_p11 = scmp.lt.s32.totalorder %s3523_s22, %s3516_s16 }
  0x27   : > { %p3520_p1 = pneg %p3519_p0  ;;  %p3526_p10 = por %p3525_p11, %p3524_p3 }
  0x29   : > { %p3527_p6 = pnand %p3526_p10, %p3520_p1 }
  0x2b   : > { %3530 = shalt.err (!%p3527_p6)
}
  0x2c   : > { %3342 = dma.hbm_to_vmem [thread:$0]  (!%p3712_p12), %s3708_s21, 256, %s3716_s23, %s240_s25  }
  0x2d   : > { %p4509_p4 = scmp.lt.s32.totalorder %s3595_s29, 5  ;;  %p4510_p5 = scmp.ge.s32.totalorder %s3595_s29, 1 }
  0x2f   : > { %p257_p13 = pnand %p4510_p5, %p4509_p4 }
  0x30   : > { %s3743_s30 = sand.u32 (!%p257_p13), 1, %s3587_s27   ;;  %p4511_p6 = scmp.ne.s32.totalorder (!%p257_p13), %s4505_s13, 0 }
  0x31   : > { %260 = sbr.rel (%p257_p13) target bundleno = 650 (0x28a), region = 48  ;;  %s3318_s9 = sshll.u32 (!%p257_p13), %s3743_s30, 4 }
  0x32   : > { %s263_s10 = scalar_lea.sflag (!%p257_p13), [#allocation4], %s3743_s30  ;;  %s3747_s12 = scalar_lea.vmem (!%p257_p13), [#allocation3], %s3318_s9 }
  0x36   : > { %3574 = dma.done.wait (%p4511_p6), %s263_s10, 256  }
  0x37   : > { %3576 = vsyncadd (%p4511_p6), %s263_s10, 4294967040  ;;  %v3598_v1 = vmov 0   ;;  %v302_v2 = vld [vmem:[%s4495_s1 + $0x8] sm:$0xf]  ;;  %v301_v3 = vld [vmem:[%s4495_s1] sm:$0xff]  ;;  %v327_v4 = vlaneseq  ;;  %v3599_v6 = vmov 1  }
  0x38   : > { %3387 = vset.pattern.permute.xlu1 %v3598_v1  ;;  %3385 = vset.pattern.permute.xlu0 %v3598_v1  ;;  %v309_v9 = vld [vmem:[%s4496_s2] sm:$0xff]  ;;  %v310_v10 = vld [vmem:[%s4496_s2 + $0x8] sm:$0xf]  ;;  %v313_v15 = vld [vmem:[%s4498_s4 + $0x10] sm:$0xff]  ;;  %v3600_v24 = vmov 0.0   ;;  %vm584_vm0 = vcmask 97280  }
  0x39   : > { %322 = vperm.xlu0 %3385, %v302_v2   ;;  %317 = vperm.xlu1 %3387, %v301_v3   ;;  %v3759_v5 = vshrl.u32 %v327_v4, 7  ;;  %v300_v11 = vld [vmem:[%s3747_s12 + $0x8] sm:$0xff]  ;;  %v3814_v31 = vld [vmem:[%s3747_s12] sm:$0xff]  ;;  %vm594_vm1 = vcmask 1043456   ;;  %s3319_s10 = sshll.u32 %s3743_s30, 3  ;;  %s3334_s21 = sshll.u32 %s3667_s6, 7 }
  0x3a   : > { %v311_v16 = vld [vmem:[%s4498_s4] sm:$0xff]  ;;  %v307_v19 = vld [vmem:[%s4499_s5 + $0x8] sm:$0xff]  ;;  %v308_v23 = vld [vmem:[%s4499_s5 + $0x10] sm:$0xff]  ;;  %687 = vmatprep.mubr.f32.mxu0 %v3600_v24  ;;  %805 = vmatprep.mubr.f32.mxu1 %v3600_v24  ;;  %s296_s23 = scalar_lea.vmem [#allocation6], %s3319_s10  ;;  %s3239_s17 = scalar_lea.hbm %s4501_s7, %s3334_s21 }
  0x3b   : > { %v433_v7 = vsub.s32 5, %v3759_v5  ;;  %v437_v8 = vsub.s32 7, %v3759_v5  ;;  %v3771_v12 = vsub.s32 1, %v3759_v5  ;;  %v312_v20 = vld [vmem:[%s4498_s4 + $0x8] sm:$0xff]  ;;  %v314_v21 = vld [vmem:[#allocation2] sm:$0x1] }
  0x3c   : > { %v306_v22 = vld [vmem:[%s4499_s5] sm:$0xff]  ;;  %v337_v25 = vsub.s32 4, %v3759_v5  ;;  %v341_v26 = vsub.s32 6, %v3759_v5  ;;  %v3806_v27 = vsub.s32 0, %v3759_v5  ;;  %v333_v28 = vsub.s32 2, %v3759_v5  ;;  %s3241_s24 = sshll.u32 %s296_s23, 4  ;;  %s3242_s24 = int_to_ptr.vmem [resolvable:$true] %s3241_s24 }
  0x3d   : > { %3386 = vset.pattern.permute.xlu0 %v3599_v6  ;;  %3388 = vset.pattern.permute.xlu1 %v3599_v6  ;;  %v450_v13 = vrot.slane %v300_v11, %v433_v7  ;;  %v454_v14 = vrot.slane %v300_v11, %v437_v8  ;;  %v429_v32 = vsub.s32 3, %v3759_v5  ;;  %v442_v39 = vrot.slane %v300_v11, %v3771_v12  ;;  %s3227_s18 = scalar_lea.sflag [#allocation5], %s3743_s30  ;;  %s3531_s12 = scalar_lea.vmem %s3242_s24, 128 }
  0x3e   : > { %420 = vperm.xlu0 %3386, %v302_v2   ;;  %416 = vperm.xlu1 %3388, %v301_v3   ;;  %v354_v29 = vrot.slane %v300_v11, %v337_v25  ;;  %v358_v30 = vrot.slane %v300_v11, %v341_v26  ;;  %v330_v33 = vrot.slane %v3814_v31, %v3806_v27  ;;  %p3532_p10 = scmp.ne.s32.totalorder %s3242_s24, %s3531_s12  ;;  %p4512_p11 = scmp.ne.s32.totalorder %s4506_s14, 0 }
  0x3f   : > { %v3784_v17 = vrot.slane %v450_v13, %v3771_v12  ;;  %v3787_v18 = vrot.slane %v454_v14, %v3771_v12  ;;  %v334_v34 = vrot.slane %v3814_v31, %v333_v28  ;;  %v346_v37 = vrot.slane %v300_v11, %v3806_v27  ;;  %s3602_s6 = smov [#allocation6]  }
  0x40   : > { %v394_v35 = vrot.slane %v354_v29, %v3806_v27  ;;  %v398_v36 = vrot.slane %v358_v30, %v3806_v27  ;;  %v350_v38 = vrot.slane %v300_v11, %v333_v28  ;;  %v426_v42 = vrot.slane %v3814_v31, %v3771_v12  ;;  %p3533_p12 = pnand %p3532_p10, %p4512_p11  ;;  %s3535_s16 = sshll.u32 %s3602_s6, 4  ;;  %s3536_s16 = int_to_ptr.vmem [resolvable:$false] %s3535_s16 }
  0x41   : > { %v430_v43 = vrot.slane %v3814_v31, %v429_v32  ;;  %v446_v44 = vrot.slane %v300_v11, %v429_v32  ;;  %v370_v45 = vrot.slane %v330_v33, %v3806_v27  ;;  %v374_v46 = vrot.slane %v334_v34, %v3806_v27  ;;  %s3537_s19 = scalar_lea.vmem %s3536_s16, 256  ;;  %p3538_p2 = scmp.lt.s32.totalorder %s3242_s24, %s3536_s16 }
  0x42   : > { %3390 = vset.pattern.permute.xlu0 %v3598_v1  ;;  %3389 = vset.pattern.permute.xlu1 %v3598_v1  ;;  %v386_v49 = vrot.slane %v346_v37, %v3806_v27  ;;  %v3837_v50 = vrot.slane %v350_v38, %v3806_v27  ;;  %v482_v51 = vrot.slane %v442_v39, %v3771_v12  ;;  %p3534_p0 = pneg %p3533_p12  ;;  %p3539_p7 = scmp.lt.s32.totalorder %s3537_s19, %s3531_s12 }
  0x43   : > { %529 = vperm.xlu0 %3390, %v309_v9   ;;  %534 = vperm.xlu1 %3389, %v310_v10   ;;  %v466_v54 = vrot.slane %v426_v42, %v3771_v12  ;;  %v470_v55 = vrot.slane %v430_v43, %v3771_v12  ;;  %v3847_v57 = vrot.slane %v446_v44, %v3771_v12 }
  0x44   : > { %v438_v61 = vrot.slane %v3814_v31, %v437_v8  ;;  %p3540_p8 = por %p3539_p7, %p3538_p2 }
  0x46   : > { %v478_v37 = vrot.slane %v438_v61, %v3771_v12  ;;  %v338_v61 = vrot.slane %v3814_v31, %v337_v25  ;;  %p3541_p9 = pnand %p3540_p8, %p3534_p0 }
  0x47   : > { %581 = vperm.xlu0 %3390, %v313_v15   ;;  %571 = vperm.xlu1 %3389, %v311_v16  }
  0x4b   : > { %3006 = vperm.xlu0 %3390, %v307_v19   ;;  %576 = vperm.xlu1 %3389, %v312_v20  }
  0x4f   : > { %3104 = vperm.xlu0 %3390, %v314_v21   ;;  %3001 = vperm.xlu1 %3389, %v306_v22  }
  0x53   : > { %3011 = vperm.xlu1 %3389, %v308_v23  }
  0xb4   : > { %v3824_v40 = vpop.permute.xlu1 %317  ;;  %v3826_v41 = vpop.permute.xlu0 %322 }
  0xb5   : > { %v405_v47 = vmul.f32 %v394_v35, %v3824_v40  ;;  %v406_v48 = vmul.f32 %v398_v36, %v3824_v40  ;;  %v413_v52 = vmul.f32 %v394_v35, %v3826_v41  ;;  %v414_v53 = vmul.f32 %v398_v36, %v3826_v41 }
  0xb6   : > { %v399_v59 = vmul.f32 %v370_v45, %v3824_v40  ;;  %v400_v60 = vmul.f32 %v374_v46, %v3824_v40  ;;  %v403_v62 = vmul.f32 %v386_v49, %v3824_v40  ;;  %v404_v2 = vmul.f32 %v3837_v50, %v3824_v40 }
  0xb7   : > { %v407_v3 = vmul.f32 %v370_v45, %v3826_v41  ;;  %v408_v28 = vmul.f32 %v374_v46, %v3826_v41  ;;  %v411_v29 = vmul.f32 %v386_v49, %v3826_v41  ;;  %v342_v35 = vrot.slane %v3814_v31, %v341_v26  ;;  %v303_v45 = vld [vmem:[%s4497_s3] sm:$0xff] }
  0xb9   : > { %v3844_v56 = vpop.permute.xlu0 %420  ;;  %v3849_v58 = vpop.permute.xlu1 %416  ;;  %v382_v46 = vrot.slane %v342_v35, %v3806_v27 }
  0xba   : > { %v507_v63 = vmul.f32 %v482_v51, %v3844_v56  ;;  %v509_v0 = vmul.f32 %v3784_v17, %v3844_v56  ;;  %v510_v1 = vmul.f32 %v3787_v18, %v3844_v56  ;;  %v495_v4 = vmul.f32 %v466_v54, %v3849_v58 }
  0xbb   : > { %v496_v6 = vmul.f32 %v470_v55, %v3849_v58  ;;  %v499_v8 = vmul.f32 %v482_v51, %v3849_v58  ;;  %v500_v9 = vmul.f32 %v3847_v57, %v3849_v58  ;;  %v501_v10 = vmul.f32 %v3784_v17, %v3849_v58 }
  0xbc   : > { %v502_v11 = vmul.f32 %v3787_v18, %v3849_v58  ;;  %v503_v13 = vmul.f32 %v466_v54, %v3844_v56  ;;  %v504_v14 = vmul.f32 %v470_v55, %v3844_v56  ;;  %v511_v16 = vadd.f32 %v495_v4, %v399_v59  ;;  %v304_v55 = vld [vmem:[%s4497_s3 + $0x8] sm:$0xff] }
  0xbd   : > { %v512_v19 = vadd.f32 %v496_v6, %v400_v60  ;;  %v515_v20 = vadd.f32 %v499_v8, %v403_v62  ;;  %v516_v21 = vadd.f32 %v500_v9, %v404_v2  ;;  %v517_v22 = vadd.f32 %v501_v10, %v405_v47 }
  0xbe   : > { %v3876_v15 = vpop.permute.xlu0 %529  ;;  %v518_v23 = vadd.f32 %v502_v11, %v406_v48  ;;  %v519_v36 = vadd.f32 %v503_v13, %v407_v3  ;;  %v3898_v38 = vpop.permute.xlu1 %534  ;;  %v520_v39 = vadd.f32 %v504_v14, %v408_v28  ;;  %v523_v42 = vadd.f32 %v507_v63, %v411_v29 }
  0xbf   : > { %v537_v17 = vadd.f32 %v3876_v15, %v511_v16  ;;  %v538_v18 = vadd.f32 %v3876_v15, %v512_v19  ;;  %v3883_v30 = vadd.f32 %v3876_v15, %v515_v20  ;;  %v3886_v32 = vadd.f32 %v3876_v15, %v516_v21 }
  0xc0   : > { %v3889_v33 = vadd.f32 %v3876_v15, %v517_v22  ;;  %v3892_v34 = vadd.f32 %v3876_v15, %v518_v23  ;;  %v525_v43 = vadd.f32 %v509_v0, %v413_v52  ;;  %v526_v44 = vadd.f32 %v510_v1, %v414_v53 }
  0xc1   : > { %3391 = vtanh.f32 %v538_v18  ;;  %v545_v26 = vadd.f32 %v3898_v38, %v519_v36  ;;  %v549_v47 = vadd.f32 %v3898_v38, %v523_v42  ;;  %v546_v49 = vadd.f32 %v3898_v38, %v520_v39 }
  0xc2   : > { %3393 = vtanh.f32 %v537_v17  ;;  %v551_v48 = vadd.f32 %v3898_v38, %v525_v43  ;;  %v552_v51 = vadd.f32 %v3898_v38, %v526_v44  ;;  %v586_v52 = vsel %vm584_vm0, %v303_v45, 0 }
  0xc3   : > { %v506_v53 = vmul.f32 %v478_v37, %v3844_v56  ;;  %v434_v54 = vrot.slane %v3814_v31, %v433_v7  ;;  %v410_v59 = vmul.f32 %v382_v46, %v3826_v41  ;;  %3395 = vtanh.f32 %v545_v26  ;;  %v305_v7 = vld [vmem:[%s4497_s3 + $0x10] sm:$0xff] }
  0xc4   : > { %v3918_v60 = vand.u32 4294901760, %v586_v52  ;;  %3397 = vtanh.f32 %v546_v49  ;;  %v589_v63 = vsel %vm584_vm0, %v304_v55, 0  ;;  %v378_v2 = vrot.slane %v338_v61, %v3806_v27 }
  0xc5   : > { %v522_v62 = vadd.f32 %v506_v53, %v410_v59  ;;  %v474_v0 = vrot.slane %v434_v54, %v3771_v12  ;;  %3399 = vtanh.f32 %v549_v47  ;;  %v3932_v3 = vand.u32 4294901760, %v589_v63 }
  0xc6   : > { %v3929_v1 = vsub.f32 %v586_v52, %v3918_v60  ;;  %v592_v31 = vsel %vm584_vm0, %v305_v7, 0  ;;  %3401 = vtanh.f32 %v552_v51  ;;  %v409_v9 = vmul.f32 %v378_v2, %v3826_v41 }
  0xc7   : > { %v548_v25 = vadd.f32 %v3898_v38, %v522_v62  ;;  %v505_v6 = vmul.f32 %v474_v0, %v3844_v56  ;;  %3403 = vtanh.f32 %v551_v48  ;;  %v3942_v10 = vsub.f32 %v589_v63, %v3932_v3 }
  0xc8   : > { %v3938_v8 = vand.u32 4294901760, %v3929_v1  ;;  %v3944_v11 = vand.u32 4294901760, %v592_v31  ;;  %v498_v13 = vmul.f32 %v478_v37, %v3849_v58  ;;  %v402_v20 = vmul.f32 %v382_v46, %v3824_v40 }
  0xc9   : > { %3405 = vtanh.f32 %v548_v25  ;;  %v521_v16 = vadd.f32 %v505_v6, %v409_v9  ;;  %v497_v21 = vmul.f32 %v474_v0, %v3849_v58  ;;  %v3956_v28 = vand.u32 4294901760, %v3942_v10 }
  0xca   : > { %v691_v23 = vsub.f32 %v3929_v1, %v3938_v8  ;;  %v3959_v29 = vsub.f32 %v592_v31, %v3944_v11  ;;  %v401_v18 = vmul.f32 %v378_v2, %v3824_v40  ;;  %v514_v35 = vadd.f32 %v498_v13, %v402_v20 }
  0xcb   : > { %v547_v58 = vadd.f32 %v3898_v38, %v521_v16  ;;  %v702_v47 = vsub.f32 %v3942_v10, %v3956_v28 }
  0xcc   : > { %v513_v44 = vadd.f32 %v497_v21, %v401_v18  ;;  %v3975_v40 = vand.u32 4294901760, %v691_v23  ;;  %v3984_v51 = vand.u32 4294901760, %v3959_v29  ;;  %v540_v53 = vadd.f32 %v3876_v15, %v514_v35 }
  0xcd   : > { %3407 = vtanh.f32 %v547_v58  ;;  %v3995_v63 = vand.u32 4294901760, %v702_v47  ;;  %v508_v35 = vmul.f32 %v3847_v57, %v3844_v56  ;;  %v412_v58 = vmul.f32 %v3837_v50, %v3826_v41 }
  0xce   : > { %v3392_v4 = vpop.eup %3391  ;;  %v539_v61 = vadd.f32 %v3876_v15, %v513_v44  ;;  %v713_v31 = vsub.f32 %v3959_v29, %v3984_v51  ;;  %3409 = vtanh.f32 %v540_v53 }
  0xcf   : > { %v3394_v12 = vpop.eup %3393  ;;  %v3947_v14 = vand.u32 4294901760, %v3392_v4  ;;  %v524_v57 = vadd.f32 %v508_v35, %v412_v58 }
  0xd0   : > { %v3949_v19 = vand.u32 4294901760, %v3394_v12  ;;  %v3396_v22 = vpop.eup %3395  ;;  %3411 = vtanh.f32 %v539_v61  ;;  %v4012_v20 = vand.u32 4294901760, %v713_v31 }
  0xd1   : > { %v3398_v17 = vpop.eup %3397  ;;  %v596_v36 = vsel %vm594_vm1, %v3396_v22, 0  ;;  %v3964_v37 = vsub.f32 %v3392_v4, %v3947_v14 }
  0xd2   : > { %v599_v39 = vsel %vm594_vm1, %v3398_v17, 0  ;;  %v3968_v42 = vand.u32 4294901760, %v596_v36  ;;  %v3971_v43 = vsub.f32 %v3394_v12, %v3949_v19  ;;  %v3400_v46 = vpop.eup %3399 }
  0xd3   : > { %v3973_v45 = vand.u32 4294901760, %v599_v39  ;;  %v763_v49 = vand.u32 4294901760, %v3964_v37  ;;  %v3987_v52 = vsel %vm594_vm1, %v3400_v46, 0  ;;  %v3402_v59 = vpop.eup %3401 }
  0xd4   : > { %v756_v26 = vsub.f32 %v596_v36, %v3968_v42  ;;  %v769_v55 = vand.u32 4294901760, %v3971_v43  ;;  %v3404_v7 = vpop.eup %3403  ;;  %v4002_v15 = vsel %vm594_vm1, %v3402_v59, 0 }
  0xd5   : > { %648 = vmatprep.subr.mxu0 %v3973_v45  ;;  %v750_v48 = vsub.f32 %v599_v39, %v3973_v45  ;;  %v764_v25 = vsub.f32 %v3964_v37, %v763_v49  ;;  %v4009_v13 = vsel %vm594_vm1, %v3404_v7, 0 }
  0xd6   : > { %650 = vmatpush1.msra.mxu0 %v3968_v42  ;;  %v757_v54 = vand.u32 4294901760, %v756_v26  ;;  %v3406_v4 = vpop.eup %3405  ;;  %v770_v12 = vsub.f32 %v3971_v43, %v769_v55 }
  0xd7   : > { %652 = vmatprep.subr.mxu0 %v3947_v14  ;;  %v751_v62 = vand.u32 4294901760, %v750_v48  ;;  %v765_v16 = vand.u32 4294901760, %v764_v25  ;;  %v605_v21 = vsel %vm594_vm1, %v3406_v4, 0  ;;  %v4129_v25 = vand.u32 4294901760, %v3987_v52 }
  0xd8   : > { %654 = vmatpush1.msra.mxu0 %v3949_v19  ;;  %v758_v0 = vsub.f32 %v756_v26, %v757_v54  ;;  %v771_v22 = vand.u32 4294901760, %v770_v12  ;;  %v4016_v23 = vand.u32 4294901760, %v605_v21 }
  0xd9   : > { %693 = vmatmul.mubr.f32.vlgmr.msra.gmra.mxu0 %v3975_v40  ;;  %857 = vmatprep.subr.mxu0 %v750_v48  ;;  %v752_v2 = vsub.f32 %v750_v48, %v751_v62  ;;  %v4143_v12 = vsub.f32 %v3987_v52, %v4129_v25 }
  0xda   : > { %860 = vmatpush1.msra.mxu0 %v756_v26  ;;  %698 = vmatprep.mubr.f32.mxu0 %v3600_v24  ;;  %v759_v6 = vand.u32 4294901760, %v758_v0  ;;  %v3408_v17 = vpop.eup %3407  ;;  %v4026_v18 = vsub.f32 %v605_v21, %v4016_v23 }
  0xdb   : > { %863 = vmatprep.subr.mxu0 %v3964_v37  ;;  %v753_v9 = vand.u32 4294901760, %v752_v2  ;;  %v602_v36 = vsel %vm594_vm1, %v3408_v17, 0  ;;  %v3410_v37 = vpop.eup %3409  ;;  %v1935_v52 = vand.u32 4294901760, %v4143_v12 }
  0xdc   : > { %866 = vmatpush1.msra.mxu0 %v3971_v43  ;;  %v1340_v56 = vand.u32 4294901760, %v4026_v18  ;;  %v4041_v43 = vand.u32 4294901760, %v602_v36  ;;  %v4045_v41 = vand.u32 4294901760, %v3410_v37 }
  0xdd   : > { %704 = vmatmul.mubr.f32.gmra.mxu0 %v3995_v63  ;;  %754 = vmatprep.subr.mxu1 %v753_v9  ;;  %v3412_v39 = vpop.eup %3411  ;;  %v1936_v17 = vsub.f32 %v4143_v12, %v1935_v52 }
  0xde   : > { %1051 = vmatprep.subr.mxu0 %v751_v62  ;;  %760 = vmatpush1.msra.mxu1 %v759_v6  ;;  %v4049_v50 = vand.u32 4294901760, %v3412_v39  ;;  %v1341_v44 = vsub.f32 %v4026_v18, %v1340_v56  ;;  %v4056_v46 = vsub.f32 %v602_v36, %v4041_v43  ;;  %v4061_v26 = vsub.f32 %v3410_v37, %v4045_v41 }
  0xdf   : > { %766 = vmatprep.subr.mxu1 %v765_v16  ;;  %709 = vmatprep.mubr.f32.mxu0 %v3600_v24  ;;  %v1937_v36 = vand.u32 4294901760, %v1936_v17 }
  0xe0   : > { %772 = vmatpush1.msra.mxu1 %v771_v22  ;;  %v4066_v47 = vsub.f32 %v3412_v39, %v4049_v50  ;;  %v1346_v48 = vand.u32 4294901760, %v4056_v46 }
  0xe1   : > { %715 = vmatmul.mubr.f32.gmra.mxu0 %v4012_v20  ;;  %807 = vmatmul.mubr.f32.vlgmr.msra.gmra.mxu1 %v3918_v60 }
  0xe2   : > { %953 = vmatprep.subr.mxu1 %v3973_v45  ;;  %812 = vmatprep.mubr.f32.mxu1 %v3600_v24 }
  0xe3   : > { %955 = vmatpush1.msra.mxu1 %v3968_v42  ;;  %899 = vmatprep.mubr.f32.mxu0 %v3600_v24 }
  0xe4   : > { %957 = vmatprep.subr.mxu1 %v3947_v14 }
  0xe5   : > { %959 = vmatpush1.msra.mxu1 %v3949_v19  ;;  %902 = vmatmul.mubr.f32.vlgmr.msra.gmra.mxu0 %v3929_v1 }
  0xe6   : > { %814 = vmatmul.mubr.f32.gmra.mxu1 %v3932_v3  ;;  %1055 = vmatpush1.msra.mxu0 %v757_v54 }
  0xe7   : > { %1147 = vmatprep.subr.mxu1 %v3973_v45  ;;  %1059 = vmatprep.subr.mxu0 %v763_v49  ;;  %v550_v45 = vadd.f32 %v3898_v38, %v524_v57  ;;  %v1342_v38 = vand.u32 4294901760, %v1341_v44  ;;  %v1358_v49 = vand.u32 4294901760, %v4066_v47  ;;  %v4215_v57 = vand.u32 4294901760, %v4009_v13 }
  0xe8   : > { %1063 = vmatpush1.msra.mxu0 %v769_v55  ;;  %819 = vmatprep.mubr.f32.mxu1 %v3600_v24 }
  0xe9   : > { %907 = vmatprep.mubr.f32.mxu0 %v3600_v24  ;;  %1237 = vmatprep.subr.mxu0 %v4016_v23  ;;  %3413 = vtanh.f32 %v550_v45  ;;  %v1359_v53 = vsub.f32 %v4066_v47, %v1358_v49  ;;  %v4229_v44 = vsub.f32 %v4009_v13, %v4215_v57 }
  0xea   : > { %821 = vmatmul.mubr.f32.gmra.mxu1 %v3944_v11  ;;  %910 = vmatmul.mubr.f32.gmra.mxu0 %v3942_v10  ;;  %3415 = vtanh.f32 %v3886_v32 }
  0xeb   : > { %915 = vmatprep.mubr.f32.mxu0 %v3600_v24  ;;  %992 = vmatprep.mubr.f32.mxu1 %v3600_v24  ;;  %v1360_v59 = vand.u32 4294901760, %v1359_v53  ;;  %3417 = vtanh.f32 %v3883_v30  ;;  %v2524_v13 = vand.u32 4294901760, %v4229_v44 }
  0xec   : > { %3419 = vtanh.f32 %v3892_v34 }
  0xed   : > { %3421 = vtanh.f32 %v3889_v33  ;;  %v4195_v33 = vand.u32 4294901760, %v4002_v15 }
  0xee   : > { %918 = vmatmul.mubr.f32.gmra.mxu0 %v3959_v29  ;;  %996 = vmatmul.mubr.f32.vlgmr.msra.gmra.mxu1 %v3938_v8 }
  0xef   : > { %1149 = vmatpush1.msra.mxu1 %v3968_v42  ;;  %1001 = vmatprep.mubr.f32.mxu1 %v3600_v24  ;;  %v1352_v42 = vand.u32 4294901760, %v4061_v26  ;;  %v4204_v34 = vsub.f32 %v4002_v15, %v4195_v33 }
  0xf0   : > { %1151 = vmatprep.subr.mxu1 %v3947_v14  ;;  %1096 = vmatprep.mubr.f32.mxu0 %v3600_v24  ;;  %v1347_v14 = vsub.f32 %v4056_v46, %v1346_v48 }
  0xf1   : > { %1153 = vmatpush1.msra.mxu1 %v3949_v19  ;;  %v1353_v19 = vsub.f32 %v4061_v26, %v1352_v42  ;;  %v2518_v15 = vand.u32 4294901760, %v4204_v34 }
  0xf2   : > { %1343 = vmatprep.subr.mxu1 %v1342_v38  ;;  %1005 = vmatmul.mubr.f32.gmra.mxu1 %v3956_v28  ;;  %v1348_v54 = vand.u32 4294901760, %v1347_v14 }
  0xf3   : > { %1098 = vmatmul.mubr.f32.vlgmr.msra.gmra.mxu0 %v3918_v60  ;;  %1010 = vmatprep.mubr.f32.mxu1 %v3600_v24  ;;  %v1354_v55 = vand.u32 4294901760, %v1353_v19 }
  0xf4   : > { %1239 = vmatpush1.msra.mxu0 %v4041_v43  ;;  %1103 = vmatprep.mubr.f32.mxu0 %v3600_v24 }
  0xf5   : > { %1241 = vmatprep.subr.mxu0 %v4045_v41 }
  0xf6   : > { %1243 = vmatpush1.msra.mxu0 %v4049_v50  ;;  %1014 = vmatmul.mubr.f32.gmra.mxu1 %v3984_v51  ;;  %v3414_v61 = vpop.eup %3413 }
  0xf7   : > { %1446 = vmatprep.subr.mxu0 %v4026_v18  ;;  %1105 = vmatmul.mubr.f32.gmra.mxu0 %v3932_v3  ;;  %v611_v62 = vsel %vm594_vm1, %v3414_v61, 0  ;;  %v3416_v0 = vpop.eup %3415 }
  0xf8   : > { %1110 = vmatprep.mubr.f32.mxu0 %v3600_v24  ;;  %1186 = vmatprep.mubr.f32.mxu1 %v3600_v24  ;;  %v4110_v30 = vand.u32 4294901760, %v611_v62  ;;  %v3418_v7 = vpop.eup %3417  ;;  %v4132_v31 = vand.u32 4294901760, %v3416_v0 }
  0xf9   : > { %v4136_v4 = vand.u32 4294901760, %v3418_v7  ;;  %v3420_v39 = vpop.eup %3419 }
  0xfa   : > { %1188 = vmatmul.mubr.f32.vlgmr.msra.gmra.mxu1 %v3918_v60  ;;  %v4118_v32 = vsub.f32 %v611_v62, %v4110_v30  ;;  %v4147_v9 = vsub.f32 %v3416_v0, %v4132_v31 }
  0xfb   : > { %1112 = vmatmul.mubr.f32.gmra.mxu0 %v3944_v11  ;;  %1349 = vmatpush1.msra.mxu1 %v1348_v54  ;;  %v4152_v16 = vsub.f32 %v3418_v7, %v4136_v4  ;;  %v4318_v7 = vpop.permute.xlu0 %581 }
  0xfc   : > { %1355 = vmatprep.subr.mxu1 %v1354_v55  ;;  %1193 = vmatprep.mubr.f32.mxu1 %v3600_v24  ;;  %v1929_v2 = vand.u32 4294901760, %v4118_v32  ;;  %v1941_v22 = vand.u32 4294901760, %v4147_v9 }
  0xfd   : > { %1361 = vmatpush1.msra.mxu1 %v1360_v59  ;;  %1276 = vmatprep.mubr.f32.mxu0 %v3600_v24 }
  0xfe   : > { %1542 = vmatprep.subr.mxu1 %v4016_v23  ;;  %1195 = vmatmul.mubr.f32.gmra.mxu1 %v3932_v3  ;;  %v1930_v6 = vsub.f32 %v4118_v32, %v1929_v2  ;;  %v1942_v18 = vsub.f32 %v4147_v9, %v1941_v22 }
  0xff   : > { %1282 = vmatmul.mubr.f32.vlgmr.msra.gmra.mxu0 %v3975_v40  ;;  %1200 = vmatprep.mubr.f32.mxu1 %v3600_v24 }
 0x100   : > { %1449 = vmatpush1.msra.mxu0 %v4056_v46  ;;  %1287 = vmatprep.mubr.f32.mxu0 %v3600_v24  ;;  %v1931_v21 = vand.u32 4294901760, %v1930_v6  ;;  %v1943_v37 = vand.u32 4294901760, %v1942_v18 }
 0x101   : > { %1452 = vmatprep.subr.mxu0 %v4061_v26 }
 0x102   : > { %1455 = vmatpush1.msra.mxu0 %v4066_v47  ;;  %1202 = vmatmul.mubr.f32.gmra.mxu1 %v3944_v11 }
 0x103   : > { %1640 = vmatprep.subr.mxu0 %v1340_v56  ;;  %1293 = vmatmul.mubr.f32.gmra.mxu0 %v3995_v63  ;;  %v3422_v56 = vpop.eup %3421 }
 0x104   : > { %1298 = vmatprep.mubr.f32.mxu0 %v3600_v24  ;;  %1394 = vmatprep.mubr.f32.mxu1 %v3600_v24 }
 0x106   : > { %1396 = vmatmul.mubr.f32.vlgmr.msra.gmra.mxu1 %v3918_v60 }
 0x107   : > { %1304 = vmatmul.mubr.f32.gmra.mxu0 %v4012_v20  ;;  %1544 = vmatpush1.msra.mxu1 %v4041_v43 }
 0x108   : > { %1546 = vmatprep.subr.mxu1 %v4045_v41  ;;  %1401 = vmatprep.mubr.f32.mxu1 %v3600_v24 }
 0x109   : > { %1548 = vmatpush1.msra.mxu1 %v4049_v50  ;;  %1488 = vmatprep.mubr.f32.mxu0 %v3600_v24 }
 0x10a   : > { %1736 = vmatprep.subr.mxu1 %v4016_v23  ;;  %1403 = vmatmul.mubr.f32.gmra.mxu1 %v3932_v3  ;;  %v1947_v23 = vand.u32 4294901760, %v4152_v16 }
 0x10b   : > { %1491 = vmatmul.mubr.f32.vlgmr.msra.gmra.mxu0 %v3929_v1  ;;  %1408 = vmatprep.mubr.f32.mxu1 %v3600_v24 }
 0x10c   : > { %1644 = vmatpush1.msra.mxu0 %v1346_v48  ;;  %1496 = vmatprep.mubr.f32.mxu0 %v3600_v24  ;;  %v1948_v35 = vsub.f32 %v4152_v16, %v1947_v23  ;;  %v2525_v48 = vsub.f32 %v4229_v44, %v2524_v13 }
 0x10d   : > { %1648 = vmatprep.subr.mxu0 %v1352_v42 }
 0x10e   : > { %1652 = vmatpush1.msra.mxu0 %v1358_v49  ;;  %1410 = vmatmul.mubr.f32.gmra.mxu1 %v3944_v11  ;;  %v1949_v58 = vand.u32 4294901760, %v1948_v35  ;;  %v2526_v14 = vand.u32 4294901760, %v2525_v48 }
 0x10f   : > { %1826 = vmatprep.subr.mxu0 %v4110_v30  ;;  %1499 = vmatmul.mubr.f32.gmra.mxu0 %v3942_v10 }
 0x110   : > { %1504 = vmatprep.mubr.f32.mxu0 %v3600_v24  ;;  %1581 = vmatprep.mubr.f32.mxu1 %v3600_v24 }
 0x112   : > { %1585 = vmatmul.mubr.f32.vlgmr.msra.gmra.mxu1 %v3938_v8 }
 0x113   : > { %1507 = vmatmul.mubr.f32.gmra.mxu0 %v3959_v29  ;;  %1738 = vmatpush1.msra.mxu1 %v4041_v43  ;;  %v4218_v43 = vand.u32 4294901760, %v3420_v39 }
 0x114   : > { %1740 = vmatprep.subr.mxu1 %v4045_v41  ;;  %1590 = vmatprep.mubr.f32.mxu1 %v3600_v24  ;;  %v4222_v41 = vand.u32 4294901760, %v3422_v56 }
 0x115   : > { %1742 = vmatpush1.msra.mxu1 %v4049_v50  ;;  %1685 = vmatprep.mubr.f32.mxu0 %v3600_v24  ;;  %v2519_v50 = vsub.f32 %v4204_v34, %v2518_v15  ;;  %v4233_v45 = vsub.f32 %v3420_v39, %v4218_v43 }
 0x116   : > { %1932 = vmatprep.subr.mxu1 %v1931_v21  ;;  %1594 = vmatmul.mubr.f32.gmra.mxu1 %v3956_v28  ;;  %v2535_v46 = vsub.f32 %v3422_v56, %v4222_v41 }
 0x117   : > { %1687 = vmatmul.mubr.f32.vlgmr.msra.gmra.mxu0 %v3918_v60  ;;  %1599 = vmatprep.mubr.f32.mxu1 %v3600_v24  ;;  %v2520_v26 = vand.u32 4294901760, %v2519_v50  ;;  %v2530_v47 = vand.u32 4294901760, %v4233_v45 }
 0x118   : > { %1828 = vmatpush1.msra.mxu0 %v4129_v25  ;;  %1692 = vmatprep.mubr.f32.mxu0 %v3600_v24  ;;  %v2536_v38 = vand.u32 4294901760, %v2535_v46 }
 0x119   : > { %1830 = vmatprep.subr.mxu0 %v4132_v31  ;;  %v2531_v42 = vsub.f32 %v4233_v45, %v2530_v47 }
 0x11a   : > { %1832 = vmatpush1.msra.mxu0 %v4136_v4  ;;  %1603 = vmatmul.mubr.f32.gmra.mxu1 %v3984_v51  ;;  %v2537_v49 = vsub.f32 %v2535_v46, %v2536_v38 }
 0x11b   : > { %2035 = vmatprep.subr.mxu0 %v4118_v32  ;;  %1694 = vmatmul.mubr.f32.gmra.mxu0 %v3932_v3  ;;  %v2532_v19 = vand.u32 4294901760, %v2531_v42 }
 0x11c   : > { %1699 = vmatprep.mubr.f32.mxu0 %v3600_v24  ;;  %1775 = vmatprep.mubr.f32.mxu1 %v3600_v24  ;;  %v2538_v53 = vand.u32 4294901760, %v2537_v49 }
 0x11e   : > { %1777 = vmatmul.mubr.f32.vlgmr.msra.gmra.mxu1 %v3918_v60 }
 0x11f   : > { %1701 = vmatmul.mubr.f32.gmra.mxu0 %v3944_v11  ;;  %1938 = vmatpush1.msra.mxu1 %v1937_v36 }
 0x120   : > { %1944 = vmatprep.subr.mxu1 %v1943_v37  ;;  %1782 = vmatprep.mubr.f32.mxu1 %v3600_v24 }
 0x121   : > { %1950 = vmatpush1.msra.mxu1 %v1949_v58  ;;  %1865 = vmatprep.mubr.f32.mxu0 %v3600_v24 }
 0x122   : > { %2131 = vmatprep.subr.mxu1 %v4110_v30  ;;  %1784 = vmatmul.mubr.f32.gmra.mxu1 %v3932_v3 }
 0x123   : > { %1871 = vmatmul.mubr.f32.vlgmr.msra.gmra.mxu0 %v3975_v40  ;;  %1789 = vmatprep.mubr.f32.mxu1 %v3600_v24 }
 0x124   : > { %2038 = vmatpush1.msra.mxu0 %v4143_v12  ;;  %1876 = vmatprep.mubr.f32.mxu0 %v3600_v24 }
 0x125   : > { %2041 = vmatprep.subr.mxu0 %v4147_v9 }
 0x126   : > { %2044 = vmatpush1.msra.mxu0 %v4152_v16  ;;  %1791 = vmatmul.mubr.f32.gmra.mxu1 %v3944_v11 }
 0x127   : > { %2229 = vmatprep.subr.mxu0 %v1929_v2  ;;  %1882 = vmatmul.mubr.f32.gmra.mxu0 %v3995_v63 }
 0x128   : > { %1887 = vmatprep.mubr.f32.mxu0 %v3600_v24  ;;  %1983 = vmatprep.mubr.f32.mxu1 %v3600_v24 }
 0x12a   : > { %1985 = vmatmul.mubr.f32.vlgmr.msra.gmra.mxu1 %v3918_v60 }
 0x12b   : > { %1893 = vmatmul.mubr.f32.gmra.mxu0 %v4012_v20  ;;  %2133 = vmatpush1.msra.mxu1 %v4129_v25 }
 0x12c   : > { %2135 = vmatprep.subr.mxu1 %v4132_v31  ;;  %1990 = vmatprep.mubr.f32.mxu1 %v3600_v24 }
 0x12d   : > { %2137 = vmatpush1.msra.mxu1 %v4136_v4  ;;  %2077 = vmatprep.mubr.f32.mxu0 %v3600_v24 }
 0x12e   : > { %2325 = vmatprep.subr.mxu1 %v4110_v30  ;;  %1992 = vmatmul.mubr.f32.gmra.mxu1 %v3932_v3 }
 0x12f   : > { %2080 = vmatmul.mubr.f32.vlgmr.msra.gmra.mxu0 %v3929_v1  ;;  %1997 = vmatprep.mubr.f32.mxu1 %v3600_v24 }
 0x130   : > { %2233 = vmatpush1.msra.mxu0 %v1935_v52  ;;  %2085 = vmatprep.mubr.f32.mxu0 %v3600_v24 }
 0x131   : > { %2237 = vmatprep.subr.mxu0 %v1941_v22 }
 0x132   : > { %2241 = vmatpush1.msra.mxu0 %v1947_v23  ;;  %1999 = vmatmul.mubr.f32.gmra.mxu1 %v3944_v11 }
 0x133   : > { %2415 = vmatprep.subr.mxu0 %v4195_v33  ;;  %2088 = vmatmul.mubr.f32.gmra.mxu0 %v3942_v10 }
 0x134   : > { %2093 = vmatprep.mubr.f32.mxu0 %v3600_v24  ;;  %2170 = vmatprep.mubr.f32.mxu1 %v3600_v24 }
 0x136   : > { %2174 = vmatmul.mubr.f32.vlgmr.msra.gmra.mxu1 %v3938_v8 }
 0x137   : > { %2096 = vmatmul.mubr.f32.gmra.mxu0 %v3959_v29  ;;  %2327 = vmatpush1.msra.mxu1 %v4129_v25 }
 0x138   : > { %2329 = vmatprep.subr.mxu1 %v4132_v31  ;;  %2179 = vmatprep.mubr.f32.mxu1 %v3600_v24 }
 0x139   : > { %2331 = vmatpush1.msra.mxu1 %v4136_v4  ;;  %2274 = vmatprep.mubr.f32.mxu0 %v3600_v24 }
 0x13a   : > { %2521 = vmatprep.subr.mxu1 %v2520_v26  ;;  %2183 = vmatmul.mubr.f32.gmra.mxu1 %v3956_v28 }
 0x13b   : > { %2276 = vmatmul.mubr.f32.vlgmr.msra.gmra.mxu0 %v3918_v60  ;;  %2188 = vmatprep.mubr.f32.mxu1 %v3600_v24 }
 0x13c   : > { %2417 = vmatpush1.msra.mxu0 %v4215_v57  ;;  %2281 = vmatprep.mubr.f32.mxu0 %v3600_v24 }
 0x13d   : > { %2419 = vmatprep.subr.mxu0 %v4218_v43 }
 0x13e   : > { %2421 = vmatpush1.msra.mxu0 %v4222_v41  ;;  %2192 = vmatmul.mubr.f32.gmra.mxu1 %v3984_v51 }
 0x13f   : > { %2624 = vmatprep.subr.mxu0 %v4204_v34  ;;  %2283 = vmatmul.mubr.f32.gmra.mxu0 %v3932_v3 }
 0x140   : > { %2288 = vmatprep.mubr.f32.mxu0 %v3600_v24  ;;  %2364 = vmatprep.mubr.f32.mxu1 %v3600_v24 }
 0x142   : > { %2366 = vmatmul.mubr.f32.vlgmr.msra.gmra.mxu1 %v3918_v60 }
 0x143   : > { %2290 = vmatmul.mubr.f32.gmra.mxu0 %v3944_v11  ;;  %2527 = vmatpush1.msra.mxu1 %v2526_v14 }
 0x144   : > { %2533 = vmatprep.subr.mxu1 %v2532_v19  ;;  %2371 = vmatprep.mubr.f32.mxu1 %v3600_v24 }
 0x145   : > { %2539 = vmatpush1.msra.mxu1 %v2538_v53  ;;  %2454 = vmatprep.mubr.f32.mxu0 %v3600_v24 }
 0x146   : > { %2720 = vmatprep.subr.mxu1 %v4195_v33  ;;  %2373 = vmatmul.mubr.f32.gmra.mxu1 %v3932_v3 }
 0x147   : > { %2460 = vmatmul.mubr.f32.vlgmr.msra.gmra.mxu0 %v3975_v40  ;;  %2378 = vmatprep.mubr.f32.mxu1 %v3600_v24 }
 0x148   : > { %2627 = vmatpush1.msra.mxu0 %v4229_v44  ;;  %2465 = vmatprep.mubr.f32.mxu0 %v3600_v24 }
 0x149   : > { %2630 = vmatprep.subr.mxu0 %v4233_v45 }
 0x14a   : > { %2633 = vmatpush1.msra.mxu0 %v2535_v46  ;;  %2380 = vmatmul.mubr.f32.gmra.mxu1 %v3944_v11 }
 0x14b   : > { %2818 = vmatprep.subr.mxu0 %v2518_v15  ;;  %2471 = vmatmul.mubr.f32.gmra.mxu0 %v3995_v63 }
 0x14c   : > { %2476 = vmatprep.mubr.f32.mxu0 %v3600_v24  ;;  %2572 = vmatprep.mubr.f32.mxu1 %v3600_v24 }
 0x14e   : > { %2574 = vmatmul.mubr.f32.vlgmr.msra.gmra.mxu1 %v3918_v60 }
 0x14f   : > { %2482 = vmatmul.mubr.f32.gmra.mxu0 %v4012_v20  ;;  %2722 = vmatpush1.msra.mxu1 %v4215_v57 }
 0x150   : > { %2724 = vmatprep.subr.mxu1 %v4218_v43  ;;  %2579 = vmatprep.mubr.f32.mxu1 %v3600_v24 }
 0x151   : > { %2726 = vmatpush1.msra.mxu1 %v4222_v41  ;;  %2666 = vmatprep.mubr.f32.mxu0 %v3600_v24 }
 0x152   : > { %2914 = vmatprep.subr.mxu1 %v4195_v33  ;;  %2581 = vmatmul.mubr.f32.gmra.mxu1 %v3932_v3 }
 0x153   : > { %2669 = vmatmul.mubr.f32.vlgmr.msra.gmra.mxu0 %v3929_v1  ;;  %2586 = vmatprep.mubr.f32.mxu1 %v3600_v24 }
 0x154   : > { %2822 = vmatpush1.msra.mxu0 %v2524_v13  ;;  %2674 = vmatprep.mubr.f32.mxu0 %v3600_v24 }
 0x155   : > { %2826 = vmatprep.subr.mxu0 %v2530_v47 }
 0x156   : > { %2830 = vmatpush1.msra.mxu0 %v2536_v38  ;;  %2588 = vmatmul.mubr.f32.gmra.mxu1 %v3944_v11 }
 0x157   : > { %2677 = vmatmul.mubr.f32.gmra.mxu0 %v3942_v10  ;;  %2759 = vmatprep.mubr.f32.mxu1 %v3600_v24 }
 0x158   : > { %2682 = vmatprep.mubr.f32.mxu0 %v3600_v24 }
 0x15a   : > { %2763 = vmatmul.mubr.f32.vlgmr.msra.gmra.mxu1 %v3938_v8 }
 0x15b   : > { %2685 = vmatmul.mubr.f32.gmra.mxu0 %v3959_v29  ;;  %2916 = vmatpush1.msra.mxu1 %v4215_v57 }
 0x15c   : > { %2918 = vmatprep.subr.mxu1 %v4218_v43  ;;  %2768 = vmatprep.mubr.f32.mxu1 %v3600_v24 }
 0x15d   : > { %2920 = vmatpush1.msra.mxu1 %v4222_v41  ;;  %2863 = vmatprep.mubr.f32.mxu0 %v3600_v24 }
 0x15e   : > { %2772 = vmatmul.mubr.f32.gmra.mxu1 %v3956_v28  ;;  %v4310_v28 = vpop.permute.xlu1 %571 }
 0x15f   : > { %2865 = vmatmul.mubr.f32.vlgmr.msra.gmra.mxu0 %v3918_v60  ;;  %2777 = vmatprep.mubr.f32.mxu1 %v3600_v24 }
 0x160   : > { %2870 = vmatprep.mubr.f32.mxu0 %v3600_v24 }
 0x162   : > { %2781 = vmatmul.mubr.f32.gmra.mxu1 %v3984_v51 }
 0x163   : > { %2872 = vmatmul.mubr.f32.gmra.mxu0 %v3932_v3  ;;  %2953 = vmatprep.mubr.f32.mxu1 %v3600_v24 }
 0x164   : > { %2877 = vmatprep.mubr.f32.mxu0 %v3600_v24 }
 0x166   : > { %2955 = vmatmul.mubr.f32.vlgmr.msra.gmra.mxu1 %v3918_v60 }
 0x167   : > { %2879 = vmatmul.mubr.f32.gmra.mxu0 %v3944_v11  ;;  %2960 = vmatprep.mubr.f32.mxu1 %v3600_v24 }
 0x16a   : > { %2962 = vmatmul.mubr.f32.gmra.mxu1 %v3932_v3  ;;  %v4314_v3 = vpop.permute.xlu1 %576 }
 0x16b   : > { %2967 = vmatprep.mubr.f32.mxu1 %v3600_v24 }
 0x16e   : > { %2969 = vmatmul.mubr.f32.gmra.mxu1 %v3944_v11 }
 0x199   : > { %v694_v1 = vpop.f32.mrf.mxu0 }
 0x19a   : > { %v695_v40 = vadd.f32 %v694_v1, %v4310_v28 }
 0x19b   : > { %v696_v8 = vpop.f32.mrf.mxu0 }
 0x19c   : > { %v697_v63 = vadd.f32 %v696_v8, %v4310_v28 }
 0x19d   : > { %v705_v10 = vpop.f32.mrf.mxu0 }
 0x19e   : > { %v706_v11 = vadd.f32 %v705_v10, %v4314_v3 }
 0x19f   : > { %v707_v29 = vpop.f32.mrf.mxu0 }
 0x1a0   : > { %v708_v30 = vadd.f32 %v707_v29, %v4314_v3 }
 0x1a1   : > { %v716_v51 = vpop.f32.mrf.mxu0  ;;  %v808_v60 = vpop.f32.mrf.mxu1 }
 0x1a2   : > { %v809_v20 = vadd.f32 %v808_v60, %v695_v40  ;;  %v717_v31 = vadd.f32 %v716_v51, %v4318_v7 }
 0x1a3   : > { %v718_v54 = vpop.f32.mrf.mxu0  ;;  %v810_v55 = vpop.f32.mrf.mxu1 }
 0x1a4   : > { %v811_v24 = vadd.f32 %v810_v55, %v697_v63  ;;  %v719_v9 = vadd.f32 %v718_v54, %v4318_v7 }
 0x1a5   : > { %v903_v59 = vpop.f32.mrf.mxu0 }
 0x1a6   : > { %v815_v61 = vpop.f32.mrf.mxu1  ;;  %v904_v62 = vadd.f32 %v903_v59, %v809_v20 }
 0x1a7   : > { %v816_v32 = vadd.f32 %v815_v61, %v706_v11  ;;  %v905_v0 = vpop.f32.mrf.mxu0 }
 0x1a8   : > { %v817_v2 = vpop.f32.mrf.mxu1  ;;  %v906_v25 = vadd.f32 %v905_v0, %v811_v24 }
 0x1a9   : > { %v818_v4 = vadd.f32 %v817_v2, %v708_v30 }
 0x1aa   : > { %v822_v6 = vpop.f32.mrf.mxu1  ;;  %v911_v12 = vpop.f32.mrf.mxu0 }
 0x1ab   : > { %v823_v16 = vadd.f32 %v822_v6, %v717_v31  ;;  %v912_v21 = vadd.f32 %v911_v12, %v816_v32 }
 0x1ac   : > { %v824_v52 = vpop.f32.mrf.mxu1  ;;  %v913_v22 = vpop.f32.mrf.mxu0 }
 0x1ad   : > { %v825_v23 = vadd.f32 %v824_v52, %v719_v9  ;;  %v914_v17 = vadd.f32 %v913_v22, %v818_v4 }
 0x1ae   : > { %v919_v18 = vpop.f32.mrf.mxu0  ;;  %v997_v35 = vpop.f32.mrf.mxu1 }
 0x1af   : > { %v920_v36 = vadd.f32 %v919_v18, %v823_v16  ;;  %v998_v37 = vadd.f32 %v997_v35, %v904_v62 }
 0x1b0   : > { %v921_v58 = vpop.f32.mrf.mxu0  ;;  %v999_v33 = vpop.f32.mrf.mxu1 }
 0x1b1   : > { %v922_v34 = vadd.f32 %v921_v58, %v825_v23  ;;  %v1000_v39 = vadd.f32 %v999_v33, %v906_v25 }
 0x1b2   : > { %v1006_v56 = vpop.f32.mrf.mxu1 }
 0x1b3   : > { %v1007_v15 = vadd.f32 %v1006_v56, %v912_v21  ;;  %v1099_v57 = vpop.f32.mrf.mxu0 }
 0x1b4   : > { %v1100_v43 = vadd.f32 %v1099_v57, %v998_v37  ;;  %v1008_v41 = vpop.f32.mrf.mxu1 }
 0x1b5   : > { %v1009_v50 = vadd.f32 %v1008_v41, %v914_v17  ;;  %v1101_v44 = vpop.f32.mrf.mxu0  ;;  %v4326_v17 = vpop.permute.xlu1 %3001 }
 0x1b6   : > { %v1102_v45 = vadd.f32 %v1101_v44, %v1000_v39  ;;  %v1015_v46 = vpop.f32.mrf.mxu1  ;;  %v4329_v39 = vpop.permute.xlu0 %3006 }
 0x1b7   : > { %v1016_v26 = vadd.f32 %v1015_v46, %v920_v36  ;;  %v1106_v13 = vpop.f32.mrf.mxu0 }
 0x1b8   : > { %v1107_v47 = vadd.f32 %v1106_v13, %v1007_v15  ;;  %v1017_v38 = vpop.f32.mrf.mxu1 }
 0x1b9   : > { %v1018_v48 = vadd.f32 %v1017_v38, %v922_v34  ;;  %v1108_v42 = vpop.f32.mrf.mxu0 }
 0x1ba   : > { %v1109_v49 = vadd.f32 %v1108_v42, %v1009_v50  ;;  %v1189_v14 = vpop.f32.mrf.mxu1 }
 0x1bb   : > { %v1113_v19 = vpop.f32.mrf.mxu0  ;;  %v1190_v53 = vadd.f32 %v1189_v14, %v1100_v43  ;;  %v4336_v14 = vpop.permute.xlu1 %3011 }
 0x1bc   : > { %v1114_v1 = vadd.f32 %v1113_v19, %v1016_v26  ;;  %v1191_v8 = vpop.f32.mrf.mxu1 }
 0x1bd   : > { %v1115_v10 = vpop.f32.mrf.mxu0  ;;  %v1192_v29 = vadd.f32 %v1191_v8, %v1102_v45  ;;  %3423 = vtanh.f32 %v1190_v53 }
 0x1be   : > { %v1116_v40 = vadd.f32 %v1115_v10, %v1018_v48  ;;  %v1196_v51 = vpop.f32.mrf.mxu1 }
 0x1bf   : > { %v1197_v60 = vadd.f32 %v1196_v51, %v1107_v47  ;;  %v1283_v63 = vpop.f32.mrf.mxu0  ;;  %3425 = vtanh.f32 %v1192_v29 }
 0x1c0   : > { %v1198_v20 = vpop.f32.mrf.mxu1  ;;  %v1284_v62 = vadd.f32 %v1283_v63, %v4310_v28 }
 0x1c1   : > { %3427 = vtanh.f32 %v1197_v60  ;;  %v1199_v54 = vadd.f32 %v1198_v20, %v1109_v49  ;;  %v1285_v55 = vpop.f32.mrf.mxu0 }
 0x1c2   : > { %v1203_v24 = vpop.f32.mrf.mxu1  ;;  %v1286_v2 = vadd.f32 %v1285_v55, %v4310_v28 }
 0x1c3   : > { %3429 = vtanh.f32 %v1199_v54  ;;  %v1204_v11 = vadd.f32 %v1203_v24, %v1114_v1  ;;  %v1294_v59 = vpop.f32.mrf.mxu0 }
 0x1c4   : > { %v1205_v61 = vpop.f32.mrf.mxu1  ;;  %v1295_v6 = vadd.f32 %v1294_v59, %v4314_v3 }
 0x1c5   : > { %3431 = vtanh.f32 %v1204_v11  ;;  %v1206_v30 = vadd.f32 %v1205_v61, %v1116_v40  ;;  %v1296_v32 = vpop.f32.mrf.mxu0 }
 0x1c6   : > { %v1397_v0 = vpop.f32.mrf.mxu1  ;;  %v1297_v21 = vadd.f32 %v1296_v32, %v4314_v3 }
 0x1c7   : > { %3433 = vtanh.f32 %v1206_v30  ;;  %v1305_v25 = vpop.f32.mrf.mxu0  ;;  %v1398_v31 = vadd.f32 %v1397_v0, %v1284_v62 }
 0x1c8   : > { %v1399_v4 = vpop.f32.mrf.mxu1  ;;  %v1306_v37 = vadd.f32 %v1305_v25, %v4318_v7 }
 0x1c9   : > { %v1307_v12 = vpop.f32.mrf.mxu0  ;;  %v1400_v9 = vadd.f32 %v1399_v4, %v1286_v2 }
 0x1ca   : > { %v1404_v16 = vpop.f32.mrf.mxu1  ;;  %v3424_v23 = vpop.eup %3423  ;;  %v1308_v41 = vadd.f32 %v1307_v12, %v4318_v7 }
 0x1cb   : > { %v1405_v52 = vadd.f32 %v1404_v16, %v1295_v6  ;;  %v1492_v22 = vpop.f32.mrf.mxu0  ;;  %v3014_v57 = vmul.f32 %v3424_v23, %v4326_v17 }
 0x1cc   : > { %v1493_v18 = vadd.f32 %v1492_v22, %v1398_v31  ;;  %v1406_v35 = vpop.f32.mrf.mxu1  ;;  %v3426_v36 = vpop.eup %3425 }
 0x1cd   : > { %v1407_v58 = vadd.f32 %v1406_v35, %v1297_v21  ;;  %v1494_v33 = vpop.f32.mrf.mxu0  ;;  %v3015_v13 = vmul.f32 %v3426_v36, %v4326_v17 }
 0x1ce   : > { %v3428_v34 = vpop.eup %3427  ;;  %v1495_v56 = vadd.f32 %v1494_v33, %v1400_v9  ;;  %v1411_v15 = vpop.f32.mrf.mxu1 }
 0x1cf   : > { %v3022_v43 = vmul.f32 %v3428_v34, %v4329_v39  ;;  %v1412_v50 = vadd.f32 %v1411_v15, %v1306_v37  ;;  %v1500_v44 = vpop.f32.mrf.mxu0 }
 0x1d0   : > { %v3430_v45 = vpop.eup %3429  ;;  %v1501_v46 = vadd.f32 %v1500_v44, %v1405_v52  ;;  %v1413_v26 = vpop.f32.mrf.mxu1 }
 0x1d1   : > { %v3038_v47 = vadd.f32 %v3022_v43, %v3014_v57  ;;  %v3023_v38 = vmul.f32 %v3430_v45, %v4329_v39  ;;  %v1414_v48 = vadd.f32 %v1413_v26, %v1308_v41  ;;  %v1502_v42 = vpop.f32.mrf.mxu0 }
 0x1d2   : > { %v3432_v49 = vpop.eup %3431  ;;  %v1503_v19 = vadd.f32 %v1502_v42, %v1407_v58  ;;  %v1586_v53 = vpop.f32.mrf.mxu1 }
 0x1d3   : > { %v3046_v1 = vadd.f32 %v3023_v38, %v3015_v13  ;;  %v3030_v8 = vmul.f32 %v3432_v49, %v4336_v14  ;;  %v1508_v10 = vpop.f32.mrf.mxu0  ;;  %v1587_v29 = vadd.f32 %v1586_v53, %v1493_v18  ;;  %v3105_v58 = vpop.permute.xlu0 %3104 }
 0x1d4   : > { %v3434_v40 = vpop.eup %3433  ;;  %v1509_v51 = vadd.f32 %v1508_v10, %v1412_v50  ;;  %v1588_v60 = vpop.f32.mrf.mxu1  ;;  %v4341_v44 = vrot.slane %v3105_v58, %v3806_v27 }
 0x1d5   : > { %v3039_v63 = vadd.f32 %v3038_v47, %v3030_v8  ;;  %v3031_v20 = vmul.f32 %v3434_v40, %v4336_v14  ;;  %v1510_v54 = vpop.f32.mrf.mxu0  ;;  %v1589_v55 = vadd.f32 %v1588_v60, %v1495_v56 }
 0x1d6   : > { %v1511_v24 = vadd.f32 %v1510_v54, %v1414_v48  ;;  %v1595_v11 = vpop.f32.mrf.mxu1 }
 0x1d7   : > { %v3040_v59 = vrot.slane %v3039_v63, 4  ;;  %v3047_v61 = vadd.f32 %v3046_v1, %v3031_v20  ;;  %v1596_v62 = vadd.f32 %v1595_v11, %v1501_v46  ;;  %v1688_v30 = vpop.f32.mrf.mxu0 }
 0x1d8   : > { %v1689_v32 = vadd.f32 %v1688_v30, %v1587_v29  ;;  %v1597_v0 = vpop.f32.mrf.mxu1 }
 0x1d9   : > { %v3041_v2 = vadd.f32 %v3040_v59, %v3039_v63  ;;  %v3048_v25 = vrot.slane %v3047_v61, 4  ;;  %v1598_v31 = vadd.f32 %v1597_v0, %v1503_v19  ;;  %v1690_v4 = vpop.f32.mrf.mxu0 }
 0x1da   : > { %v1691_v6 = vadd.f32 %v1690_v4, %v1589_v55  ;;  %v1604_v12 = vpop.f32.mrf.mxu1 }
 0x1db   : > { %v3042_v9 = vrot.slane %v3041_v2, 2  ;;  %v3049_v16 = vadd.f32 %v3048_v25, %v3047_v61  ;;  %v1605_v21 = vadd.f32 %v1604_v12, %v1509_v51  ;;  %v1695_v52 = vpop.f32.mrf.mxu0 }
 0x1dc   : > { %v1696_v22 = vadd.f32 %v1695_v52, %v1596_v62  ;;  %v1606_v23 = vpop.f32.mrf.mxu1 }
 0x1dd   : > { %v3043_v18 = vadd.f32 %v3042_v9, %v3041_v2  ;;  %v3050_v35 = vrot.slane %v3049_v16, 2  ;;  %v1607_v36 = vadd.f32 %v1606_v23, %v1511_v24  ;;  %v1697_v37 = vpop.f32.mrf.mxu0 }
 0x1de   : > { %v1698_v33 = vadd.f32 %v1697_v37, %v1598_v31  ;;  %v1778_v34 = vpop.f32.mrf.mxu1 }
 0x1df   : > { %v3044_v56 = vrot.slane %v3043_v18, 1  ;;  %v3051_v15 = vadd.f32 %v3050_v35, %v3049_v16  ;;  %v1702_v57 = vpop.f32.mrf.mxu0  ;;  %v1779_v43 = vadd.f32 %v1778_v34, %v1689_v32 }
 0x1e0   : > { %v1703_v41 = vadd.f32 %v1702_v57, %v1605_v21  ;;  %v1780_v50 = vpop.f32.mrf.mxu1 }
 0x1e1   : > { %v3045_v45 = vadd.f32 %v3044_v56, %v3043_v18  ;;  %v3052_v46 = vrot.slane %v3051_v15, 1  ;;  %v1704_v26 = vpop.f32.mrf.mxu0  ;;  %v1781_v13 = vadd.f32 %v1780_v50, %v1691_v6  ;;  %3435 = vtanh.f32 %v1779_v43 }
 0x1e2   : > { %v1705_v47 = vadd.f32 %v1704_v26, %v1607_v36  ;;  %v1785_v38 = vpop.f32.mrf.mxu1 }
 0x1e3   : > { %v3111_v48 = vadd.f32 %v4341_v44, %v3045_v45  ;;  %v3053_v42 = vadd.f32 %v3052_v46, %v3051_v15  ;;  %v1786_v49 = vadd.f32 %v1785_v38, %v1696_v22  ;;  %v4344_v19 = vpop.f32.mrf.mxu0 }
 0x1e4   : > { %v1787_v53 = vpop.f32.mrf.mxu1 }
 0x1e5   : > { %v3320_v1 = vmul.f32 -1.442695, %v3111_v48  ;;  %v3112_v8 = vadd.f32 %v4341_v44, %v3053_v42  ;;  %3437 = vtanh.f32 %v1786_v49  ;;  %v1788_v27 = vadd.f32 %v1787_v53, %v1698_v33  ;;  %v4347_v10 = vpop.f32.mrf.mxu0 }
 0x1e6   : > { %3439 = vtanh.f32 %v1781_v13  ;;  %v1792_v29 = vpop.f32.mrf.mxu1 }
 0x1e7   : > { %3441 = vpow2.f32 %v3320_v1  ;;  %v3321_v40 = vmul.f32 -1.442695, %v3112_v8  ;;  %v1793_v51 = vadd.f32 %v1792_v29, %v1703_v41  ;;  %v4349_v60 = vpop.f32.mrf.mxu0 }
 0x1e8   : > { %3443 = vtanh.f32 %v1788_v27  ;;  %v1794_v63 = vpop.f32.mrf.mxu1 }
 0x1e9   : > { %3445 = vpow2.f32 %v3321_v40  ;;  %v1795_v20 = vadd.f32 %v1794_v63, %v1705_v47  ;;  %v1885_v54 = vpop.f32.mrf.mxu0 }
 0x1ea   : > { %3447 = vtanh.f32 %v1793_v51  ;;  %v4351_v55 = vpop.f32.mrf.mxu1 }
 0x1eb   : > { %3449 = vtanh.f32 %v1795_v20  ;;  %v4353_v24 = vpop.f32.mrf.mxu0 }
 0x1ec   : > { %v1988_v11 = vpop.f32.mrf.mxu1 }
 0x1ed   : > { %v4355_v59 = vpop.f32.mrf.mxu0 }
 0x1ee   : > { %v4357_v61 = vpop.f32.mrf.mxu1  ;;  %v3436_v30 = vpop.eup %3435 }
 0x1ef   : > { %v4359_v62 = vpop.f32.mrf.mxu0  ;;  %v3016_v4 = vmul.f32 %v3436_v30, %v4326_v17  ;;  %v1875_v30 = vadd.f32 %v4347_v10, %v4310_v28 }
 0x1f0   : > { %v1995_v32 = vpop.f32.mrf.mxu1 }
 0x1f1   : > { %v4361_v0 = vpop.f32.mrf.mxu0 }
 0x1f2   : > { %v3438_v2 = vpop.eup %3437  ;;  %v4363_v25 = vpop.f32.mrf.mxu1 }
 0x1f3   : > { %v3440_v31 = vpop.eup %3439  ;;  %v3024_v6 = vmul.f32 %v3438_v2, %v4329_v39  ;;  %v4367_v12 = vpop.f32.mrf.mxu0 }
 0x1f4   : > { %v3442_v9 = vpop.eup %3441  ;;  %v2002_v16 = vpop.f32.mrf.mxu1  ;;  %v3017_v35 = vmul.f32 %v3440_v31, %v4326_v17 }
 0x1f5   : > { %v3444_v21 = vpop.eup %3443  ;;  %v3143_v52 = vadd.f32 1.0, %v3442_v9  ;;  %v3054_v22 = vadd.f32 %v3024_v6, %v3016_v4  ;;  %v2091_v23 = vpop.f32.mrf.mxu0  ;;  %v1886_v6 = vadd.f32 %v1885_v54, %v4314_v3 }
 0x1f6   : > { %v3446_v18 = vpop.eup %3445  ;;  %v3025_v36 = vmul.f32 %v3444_v21, %v4329_v39  ;;  %v4371_v37 = vpop.f32.mrf.mxu1 }
 0x1f7   : > { %v3448_v58 = vpop.eup %3447  ;;  %v3144_v33 = vadd.f32 1.0, %v3446_v18  ;;  %v4373_v34 = vpop.f32.mrf.mxu0  ;;  %3451 = vrcp.f32 %v3143_v52  ;;  %v1884_v52 = vadd.f32 %v4349_v60, %v4314_v3  ;;  %v1989_v18 = vadd.f32 %v1988_v11, %v1875_v30 }
 0x1f8   : > { %v3450_v56 = vpop.eup %3449  ;;  %v3062_v15 = vadd.f32 %v3025_v36, %v3017_v35  ;;  %v3032_v57 = vmul.f32 %v3448_v58, %v4336_v14  ;;  %v2177_v43 = vpop.f32.mrf.mxu1  ;;  %v1873_v58 = vadd.f32 %v4344_v19, %v4310_v28  ;;  %v1895_v19 = vadd.f32 %v4353_v24, %v4318_v7 }
 0x1f9   : > { %3453 = vrcp.f32 %v3144_v33  ;;  %v3033_v41 = vmul.f32 %v3450_v56, %v4336_v14  ;;  %v2099_v50 = vpop.f32.mrf.mxu0  ;;  %v1897_v33 = vadd.f32 %v4355_v59, %v4318_v7  ;;  %v1996_v56 = vadd.f32 %v1995_v32, %v1886_v6 }
 0x1fa   : > { %v3055_v45 = vadd.f32 %v3054_v22, %v3032_v57  ;;  %v2184_v46 = vpop.f32.mrf.mxu1  ;;  %v1994_v57 = vadd.f32 %v4357_v61, %v1884_v52 }
 0x1fb   : > { %v3063_v26 = vadd.f32 %v3062_v15, %v3033_v41  ;;  %v4377_v13 = vpop.f32.mrf.mxu0  ;;  %v2084_v41 = vadd.f32 %v4361_v0, %v1989_v18 }
 0x1fc   : > { %v3056_v47 = vrot.slane %v3055_v45, 4  ;;  %v2186_v38 = vpop.f32.mrf.mxu1  ;;  %v2090_v61 = vadd.f32 %v4367_v12, %v1994_v57 }
 0x1fd   : > { %v3064_v48 = vrot.slane %v3063_v26, 4  ;;  %v2279_v42 = vpop.f32.mrf.mxu0  ;;  %v2178_v0 = vadd.f32 %v2177_v43, %v2084_v41 }
 0x1fe   : > { %v3057_v49 = vadd.f32 %v3056_v47, %v3055_v45  ;;  %v2193_v53 = vpop.f32.mrf.mxu1  ;;  %v2092_v47 = vadd.f32 %v2091_v23, %v1996_v56 }
 0x1ff   : > { %v3065_v1 = vadd.f32 %v3064_v48, %v3063_v26  ;;  %v2284_v8 = vpop.f32.mrf.mxu0  ;;  %v2003_v26 = vadd.f32 %v2002_v16, %v1897_v33  ;;  %v1987_v48 = vadd.f32 %v4351_v55, %v1873_v58  ;;  %v2185_v16 = vadd.f32 %v2184_v46, %v2090_v61 }
 0x200   : > { %v3058_v27 = vrot.slane %v3057_v49, 2  ;;  %v2195_v29 = vpop.f32.mrf.mxu1  ;;  %v2280_v23 = vadd.f32 %v2279_v42, %v2178_v0 }
 0x201   : > { %v3066_v40 = vrot.slane %v3065_v1, 2  ;;  %v2286_v51 = vpop.f32.mrf.mxu0  ;;  %v2082_v24 = vadd.f32 %v4359_v62, %v1987_v48 }
 0x202   : > { %v3059_v63 = vadd.f32 %v3058_v27, %v3057_v49  ;;  %v4379_v20 = vpop.f32.mrf.mxu1  ;;  %v2001_v27 = vadd.f32 %v4363_v25, %v1895_v19  ;;  %v3601_v19 = vmov 1966171168  }
 0x203   : > { %v3067_v2 = vadd.f32 %v3066_v40, %v3065_v1  ;;  %v2291_v31 = vpop.f32.mrf.mxu0  ;;  %v2100_v40 = vadd.f32 %v2099_v50, %v2003_v26  ;;  %v2176_v52 = vadd.f32 %v4371_v37, %v2082_v24  ;;  %v3180_v26 = vunpack.c.l.s4 %v3601_v19 }
 0x204   : > { %v3060_v4 = vrot.slane %v3059_v63, 1  ;;  %v2369_v9 = vpop.f32.mrf.mxu1  ;;  %v4384_v21 = vpop.eup %3451  ;;  %v2098_v55 = vadd.f32 %v4373_v34, %v2001_v27 }
 0x205   : > { %v3068_v22 = vrot.slane %v3067_v2, 1  ;;  %v2293_v35 = vpop.f32.mrf.mxu0  ;;  %v2196_v6 = vadd.f32 %v2195_v29, %v2100_v40  ;;  %v2370_v25 = vadd.f32 %v2369_v9, %v2280_v23  ;;  %v2278_v62 = vadd.f32 %v4377_v13, %v2176_v52 }
 0x206   : > { %v4388_v36 = vpop.eup %3453  ;;  %v3061_v10 = vadd.f32 %v3060_v4, %v3059_v63  ;;  %v2374_v54 = vpop.f32.mrf.mxu1  ;;  %v2187_v63 = vadd.f32 %v2186_v38, %v2092_v47  ;;  %v2194_v38 = vadd.f32 %v2193_v53, %v2098_v55  ;;  %v3181_v27 = vunpack.c.0.s8 %v3180_v26 }
 0x207   : > { %v3069_v15 = vadd.f32 %v3068_v22, %v3067_v2  ;;  %v4396_v60 = vpop.f32.mrf.mxu0  ;;  %v3175_v11 = vcombine.low %v4384_v21, %v4388_v36  ;;  %v2285_v22 = vadd.f32 %v2284_v8, %v2185_v16  ;;  %v2294_v18 = vadd.f32 %v2293_v35, %v2196_v6 }
 0x208   : > { %v3113_v45 = vadd.f32 %v4341_v44, %v3061_v10  ;;  %v2376_v59 = vpop.f32.mrf.mxu1  ;;  %v2287_v12 = vadd.f32 %v2286_v51, %v2187_v63  ;;  %v2292_v33 = vadd.f32 %v2291_v31, %v2194_v38  ;;  %v2368_v29 = vadd.f32 %v4379_v20, %v2278_v62 }
 0x209   : > { %v3114_v32 = vadd.f32 %v4341_v44, %v3069_v15  ;;  %v4406_v49 = vpop.f32.mrf.mxu0  ;;  %v2375_v46 = vadd.f32 %v2374_v54, %v2285_v22  ;;  %v2462_v0 = vadd.f32 %v4396_v60, %v4310_v28 }
 0x20a   : > { %v3322_v1 = vmul.f32 -1.442695, %v3113_v45  ;;  %v2381_v30 = vpop.f32.mrf.mxu1  ;;  %v2377_v58 = vadd.f32 %v2376_v59, %v2287_v12 }
 0x20b   : > { %v3323_v2 = vmul.f32 -1.442695, %v3114_v32  ;;  %v2472_v4 = vpop.f32.mrf.mxu0  ;;  %v2382_v37 = vadd.f32 %v2381_v30, %v2292_v33 }
 0x20c   : > { %3455 = vpow2.f32 %v3322_v1  ;;  %v2383_v43 = vpop.f32.mrf.mxu1  ;;  %v2473_v55 = vadd.f32 %v2472_v4, %v4314_v3 }
 0x20d   : > { %3457 = vpow2.f32 %v3323_v2  ;;  %v2474_v50 = vpop.f32.mrf.mxu0  ;;  %v2384_v56 = vadd.f32 %v2383_v43, %v2294_v18  ;;  %v2464_v2 = vadd.f32 %v4406_v49, %v4310_v28 }
 0x20e   : > { %v2575_v10 = vpop.f32.mrf.mxu1  ;;  %3459 = vtanh.f32 %v2370_v25  ;;  %v4421_v25 = vsub.s32 %v3181_v27, %v3759_v5  ;;  %v2475_v28 = vadd.f32 %v2474_v50, %v4314_v3 }
 0x20f   : > { %v2483_v42 = vpop.f32.mrf.mxu0  ;;  %3461 = vtanh.f32 %v2377_v58  ;;  %v2576_v24 = vadd.f32 %v2575_v10, %v2462_v0 }
 0x210   : > { %v2577_v34 = vpop.f32.mrf.mxu1  ;;  %3463 = vtanh.f32 %v2375_v46  ;;  %v2484_v49 = vadd.f32 %v2483_v42, %v4318_v7 }
 0x211   : > { %v2485_v51 = vpop.f32.mrf.mxu0  ;;  %3465 = vtanh.f32 %v2384_v56  ;;  %v2578_v52 = vadd.f32 %v2577_v34, %v2464_v2 }
 0x212   : > { %v2582_v8 = vpop.f32.mrf.mxu1  ;;  %3467 = vtanh.f32 %v2368_v29  ;;  %v2486_v5 = vadd.f32 %v2485_v51, %v4318_v7 }
 0x213   : > { %v2670_v9 = vpop.f32.mrf.mxu0  ;;  %3469 = vtanh.f32 %v2382_v37  ;;  %v2583_v58 = vadd.f32 %v2582_v8, %v2473_v55 }
 0x214   : > { %v2584_v53 = vpop.f32.mrf.mxu1  ;;  %v2671_v22 = vadd.f32 %v2670_v9, %v2576_v24 }
 0x215   : > { %v2672_v35 = vpop.f32.mrf.mxu0  ;;  %v2585_v29 = vadd.f32 %v2584_v53, %v2475_v28 }
 0x216   : > { %v2589_v13 = vpop.f32.mrf.mxu1  ;;  %v2673_v46 = vadd.f32 %v2672_v35, %v2578_v52 }
 0x217   : > { %v2678_v54 = vpop.f32.mrf.mxu0 }
 0x218   : > { %v2591_v15 = vpop.f32.mrf.mxu1  ;;  %v2679_v37 = vadd.f32 %v2678_v54, %v2583_v58 }
 0x219   : > { %v3456_v31 = vpop.eup %3455  ;;  %v2680_v57 = vpop.f32.mrf.mxu0 }
 0x21a   : > { %v3458_v41 = vpop.eup %3457  ;;  %v3145_v45 = vadd.f32 1.0, %v3456_v31  ;;  %v2764_v20 = vpop.f32.mrf.mxu1  ;;  %v2681_v19 = vadd.f32 %v2680_v57, %v2585_v29 }
 0x21b   : > { %v3146_v47 = vadd.f32 1.0, %v3458_v41  ;;  %v2686_v59 = vpop.f32.mrf.mxu0  ;;  %v3460_v61 = vpop.eup %3459  ;;  %v2765_v33 = vadd.f32 %v2764_v20, %v2671_v22  ;;  %v2592_v20 = vadd.f32 %v2591_v15, %v2486_v5 }
 0x21c   : > { %3471 = vrcp.f32 %v3145_v45  ;;  %v2766_v32 = vpop.f32.mrf.mxu1  ;;  %v3462_v40 = vpop.eup %3461  ;;  %v3019_v4 = vmul.f32 %v3460_v61, %v4326_v17  ;;  %v2590_v45 = vadd.f32 %v2589_v13, %v2484_v49 }
 0x21d   : > { %3473 = vrcp.f32 %v3146_v47  ;;  %v2688_v48 = vpop.f32.mrf.mxu0  ;;  %v3464_v30 = vpop.eup %3463  ;;  %v3027_v43 = vmul.f32 %v3462_v40, %v4329_v39  ;;  %v2767_v50 = vadd.f32 %v2766_v32, %v2673_v46 }
 0x21e   : > { %v2773_v1 = vpop.f32.mrf.mxu1  ;;  %v3466_v23 = vpop.eup %3465  ;;  %v3026_v18 = vmul.f32 %v3464_v30, %v4329_v39  ;;  %v2687_v51 = vadd.f32 %v2686_v59, %v2590_v45  ;;  %v2689_v2 = vadd.f32 %v2688_v48, %v2592_v20  ;;  %v4435_v59 = vrot.slane %v3175_v11, %v4421_v25 }
 0x21f   : > { %v2866_v63 = vpop.f32.mrf.mxu0  ;;  %v3468_v12 = vpop.eup %3467  ;;  %v3035_v62 = vmul.f32 %v3466_v23, %v4336_v14  ;;  %v3078_v31 = vadd.f32 %v3027_v43, %v3019_v4  ;;  %v2774_v26 = vadd.f32 %v2773_v1, %v2679_v37 }
 0x220   : > { %v2775_v16 = vpop.f32.mrf.mxu1  ;;  %v3470_v38 = vpop.eup %3469  ;;  %v3018_v34 = vmul.f32 %v3468_v12, %v4326_v17  ;;  %v2867_v42 = vadd.f32 %v2866_v63, %v2765_v33 }
 0x221   : > { %v2868_v6 = vpop.f32.mrf.mxu0  ;;  %v3034_v3 = vmul.f32 %v3470_v38, %v4336_v14  ;;  %v3079_v35 = vadd.f32 %v3078_v31, %v3035_v62  ;;  %v2776_v53 = vadd.f32 %v2775_v16, %v2681_v19 }
 0x222   : > { %v2782_v60 = vpop.f32.mrf.mxu1  ;;  %v3070_v41 = vadd.f32 %v3026_v18, %v3018_v34  ;;  %v2869_v47 = vadd.f32 %v2868_v6, %v2767_v50 }
 0x223   : > { %v2873_v10 = vpop.f32.mrf.mxu0  ;;  %v2783_v24 = vadd.f32 %v2782_v60, %v2687_v51  ;;  %v3080_v1 = vrot.slane %v3079_v35, 4 }
 0x224   : > { %v2784_v56 = vpop.f32.mrf.mxu1  ;;  %v2874_v54 = vadd.f32 %v2873_v10, %v2774_v26  ;;  %v3071_v30 = vadd.f32 %v3070_v41, %v3034_v3 }
 0x225   : > { %v2875_v9 = vpop.f32.mrf.mxu0  ;;  %v2785_v55 = vadd.f32 %v2784_v56, %v2689_v2  ;;  %v3081_v28 = vadd.f32 %v3080_v1, %v3079_v35 }
 0x226   : > { %v2956_v8 = vpop.f32.mrf.mxu1  ;;  %v2876_v23 = vadd.f32 %v2875_v9, %v2776_v53  ;;  %v3072_v43 = vrot.slane %v3071_v30, 4 }
 0x227   : > { %v2880_v61 = vpop.f32.mrf.mxu0  ;;  %v2957_v0 = vadd.f32 %v2956_v8, %v2867_v42  ;;  %v3082_v11 = vrot.slane %v3081_v28, 2 }
 0x228   : > { %v2958_v27 = vpop.f32.mrf.mxu1  ;;  %v2881_v16 = vadd.f32 %v2880_v61, %v2783_v24  ;;  %v3073_v36 = vadd.f32 %v3072_v43, %v3071_v30 }
 0x229   : > { %v3472_v7 = vpop.eup %3471  ;;  %v2959_v32 = vadd.f32 %v2958_v27, %v2869_v47  ;;  %3475 = vtanh.f32 %v2957_v0  ;;  %v2882_v15 = vpop.f32.mrf.mxu0  ;;  %v3083_v10 = vadd.f32 %v3082_v11, %v3081_v28 }
 0x22a   : > { %v3474_v40 = vpop.eup %3473  ;;  %v2963_v63 = vpop.f32.mrf.mxu1  ;;  %v2883_v22 = vadd.f32 %v2882_v15, %v2785_v55  ;;  %v3074_v49 = vrot.slane %v3073_v36, 2 }
 0x22b   : > { %v2964_v13 = vadd.f32 %v2963_v63, %v2874_v54  ;;  %v3176_v57 = vcombine.low %v3472_v7, %v3474_v40  ;;  %v3084_v34 = vrot.slane %v3083_v10, 1 }
 0x22c   : > { %v2965_v6 = vpop.f32.mrf.mxu1  ;;  %v3075_v46 = vadd.f32 %v3074_v49, %v3073_v36 }
 0x22d   : > { %3477 = vtanh.f32 %v2964_v13  ;;  %v2966_v48 = vadd.f32 %v2965_v6, %v2876_v23  ;;  %v4438_v12 = vrot.slane %v3176_v57, %v4421_v25  ;;  %v3085_v8 = vadd.f32 %v3084_v34, %v3083_v10 }
 0x22e   : > { %3479 = vtanh.f32 %v2959_v32  ;;  %v2970_v52 = vpop.f32.mrf.mxu1  ;;  %v3076_v9 = vrot.slane %v3075_v46, 1 }
 0x22f   : > { %3481 = vtanh.f32 %v2966_v48  ;;  %v2971_v60 = vadd.f32 %v2970_v52, %v2881_v16  ;;  %v3207_v38 = vcombine.low %v4435_v59, %v4438_v12 }
 0x230   : > { %v2972_v18 = vpop.f32.mrf.mxu1  ;;  %v3077_v26 = vadd.f32 %v3076_v9, %v3075_v46 }
 0x231   : > { %v2973_v21 = vadd.f32 %v2972_v18, %v2883_v22  ;;  %3483 = vtanh.f32 %v2971_v60  ;;  %v3215_v49 = vrot.slane %v3207_v38, %v4421_v25 }
 0x232   : > { %v3115_v0 = vadd.f32 %v4341_v44, %v3077_v26 }
 0x233   : > { %3485 = vtanh.f32 %v2973_v21 }
 0x234   : > { %v3324_v54 = vmul.f32 -1.442695, %v3115_v0 }
 0x236   : > { %v3476_v58 = vpop.eup %3475 }
 0x237   : > { %v3020_v29 = vmul.f32 %v3476_v58, %v4326_v17 }
 0x23a   : > { %v3478_v4 = vpop.eup %3477 }
 0x23b   : > { %v3480_v62 = vpop.eup %3479  ;;  %v3028_v56 = vmul.f32 %v3478_v4, %v4329_v39 }
 0x23c   : > { %v3482_v33 = vpop.eup %3481  ;;  %v3021_v31 = vmul.f32 %v3480_v62, %v4326_v17 }
 0x23d   : > { %v3029_v5 = vmul.f32 %v3482_v33, %v4329_v39  ;;  %v3086_v50 = vadd.f32 %v3028_v56, %v3020_v29  ;;  %v3116_v39 = vadd.f32 %v4341_v44, %v3085_v8 }
 0x23e   : > { %v3484_v37 = vpop.eup %3483 }
 0x23f   : > { %v3036_v42 = vmul.f32 %v3484_v37, %v4336_v14  ;;  %v3094_v41 = vadd.f32 %v3029_v5, %v3021_v31  ;;  %v3325_v7 = vmul.f32 -1.442695, %v3116_v39 }
 0x240   : > { %v3486_v3 = vpop.eup %3485 }
 0x241   : > { %v3037_v45 = vmul.f32 %v3486_v3, %v4336_v14  ;;  %v3087_v19 = vadd.f32 %v3086_v50, %v3036_v42  ;;  %3487 = vpow2.f32 %v3325_v7 }
 0x242   : > { %3489 = vpow2.f32 %v3324_v54 }
 0x243   : > { %v3095_v35 = vadd.f32 %v3094_v41, %v3037_v45  ;;  %v3088_v20 = vrot.slane %v3087_v19, 4 }
 0x245   : > { %v3096_v47 = vrot.slane %v3095_v35, 4  ;;  %v3089_v61 = vadd.f32 %v3088_v20, %v3087_v19 }
 0x247   : > { %v3097_v27 = vadd.f32 %v3096_v47, %v3095_v35  ;;  %v3090_v17 = vrot.slane %v3089_v61, 2 }
 0x249   : > { %v3098_v51 = vrot.slane %v3097_v27, 2  ;;  %v3091_v53 = vadd.f32 %v3090_v17, %v3089_v61 }
 0x24b   : > { %v3099_v40 = vadd.f32 %v3098_v51, %v3097_v27  ;;  %v3092_v30 = vrot.slane %v3091_v53, 1 }
 0x24d   : > { %v3100_v14 = vrot.slane %v3099_v40, 1  ;;  %v3093_v2 = vadd.f32 %v3092_v30, %v3091_v53 }
 0x24e   : > { %v3488_v57 = vpop.eup %3487 }
 0x24f   : > { %v3101_v32 = vadd.f32 %v3100_v14, %v3099_v40  ;;  %v3117_v63 = vadd.f32 %v4341_v44, %v3093_v2  ;;  %v3490_v1 = vpop.eup %3489  ;;  %v3148_v55 = vadd.f32 1.0, %v3488_v57 }
 0x250   : > { %v3147_v15 = vadd.f32 1.0, %v3490_v1 }
 0x251   : > { %v3118_v24 = vadd.f32 %v4341_v44, %v3101_v32  ;;  %v3326_v23 = vmul.f32 -1.442695, %v3117_v63 }
 0x253   : > { %v3327_v13 = vmul.f32 -1.442695, %v3118_v24  ;;  %3491 = vpow2.f32 %v3326_v23 }
 0x255   : > { %3493 = vpow2.f32 %v3327_v13 }
 0x256   : > { %3495 = vrcp.f32 %v3148_v55 }
 0x257   : > { %3497 = vrcp.f32 %v3147_v15 }
 0x260   : > { %v3492_v6 = vpop.eup %3491 }
 0x261   : > { %v3149_v48 = vadd.f32 1.0, %v3492_v6 }
 0x262   : > { %v3494_v16 = vpop.eup %3493 }
 0x263   : > { %v3150_v43 = vadd.f32 1.0, %v3494_v16  ;;  %3499 = vrcp.f32 %v3149_v48  ;;  %v3496_v52 = vpop.eup %3495 }
 0x264   : > { %v3498_v44 = vpop.eup %3497 }
 0x265   : > { %3501 = vrcp.f32 %v3150_v43  ;;  %v3177_v60 = vcombine.low %v3498_v44, %v3496_v52 }
 0x267   : > { %v3199_v21 = vrot.slane %v3177_v60, %v4421_v25 }
 0x270   : > { %v3500_v22 = vpop.eup %3499 }
 0x272   : > { %v3502_v18 = vpop.eup %3501 }
 0x273   : > { %v3178_v28 = vcombine.low %v3500_v22, %v3502_v18 }
 0x275   : > { %v3206_v36 = vrot.slane %v3178_v28, %v4421_v25 }
 0x277   : > { %v3208_v11 = vcombine.low %v3199_v21, %v3206_v36 }
 0x279   : > { %v3222_v58 = vrot.slane %v3208_v11, %v4421_v25 }
 0x27b   : > { %v3223_v10 = vcombine.low %v3215_v49, %v3222_v58 }
 0x27d   : > { %3225 = vst [vmem:[%s296_s23] sm:$0xff] %v3223_v10 }
 0x27e   : > { %3544 = shalt.err (!%p3541_p9)
}
 0x27f   : > { %s3545_s20 = scalar_lea.hbm %s3239_s17, 128  ;;  %s3549_s9 = scalar_lea.hbm %s4501_s7, 512 }
 0x280   : > { %p3546_p1 = scmp.ne.s32.totalorder %s3239_s17, %s3545_s20  ;;  %p3550_p5 = scmp.lt.s32.totalorder %s3239_s17, %s4501_s7 }
 0x281   : > { %p3551_p13 = scmp.lt.s32.totalorder %s3549_s9, %s3545_s20 }
 0x282   : > { %p3547_p3 = pnand %p3546_p1, %p4512_p11 }
 0x283   : > { %p3552_p6 = por %p3551_p13, %p3550_p5 }
 0x284   : > { %p3548_p4 = pneg %p3547_p3 }
 0x286   : > { %p3553_p10 = pnand %p3552_p6, %p3548_p4 }
 0x288   : > { %3556 = shalt.err (!%p3553_p10)
}
 0x289   : > { %3337 = dma.vmem_to_hbm [thread:$0]  (%p4512_p11), %s3242_s24, 128, %s3239_s17, %s3227_s18  }
 0x28a PF: > { %p3348_p12 = scmp.ge.s32.totalorder %s3595_s29, 2  ;;  %s3253_s23 = sand.u32 1, %s3583_s26  }
 0x28b   : > { %p4513_p0 = scmp.ne.s32.totalorder %s4507_s15, 0  ;;  %s3254_s25 = scalar_lea.sflag [#allocation5], %s3253_s23 }
 0x28d   : > { %p3344_p2 = pnand %p3348_p12, %p4513_p0 }
 0x28f   : > { %p3345_p7 = pneg %p3344_p2 }
 0x291   : > { %3578 = dma.done.wait (%p3345_p7), %s3254_s25, 128  }
 0x292   : > { %3580 = vsyncadd (%p3345_p7), %s3254_s25, 4294967168  ;;  %p22_p8 = scmp.ge.s32.totalorder %s3671_s8, 6   ;;  %s4514_s26 = smov %s3587_s27 }
 0x293   : > { %s4515_s27 = smov %s3591_s28  ;;  %s4516_s28 = smov %s3683_s11 }
 0x294   : > { %s4517_s29 = smov %s3671_s8  ;;  %24 = sbr.rel (!%p22_p8) target bundleno = 8 (0x8), region = 93 }
 0x299   :  { %3259 = vsyncpa [#allocation4], 1 }
 0x29a   :  { %3261 = vsyncpa [#allocation4 + $0x1], 1 }
 0x29b   :  { %3262 = vsyncpa [#allocation5], 1 }
 0x29c   :  { %3264 = vsyncpa [#allocation5 + $0x1], 1 }

</bundles_post_ra>
